<compile_context>
chip_gen: v7x
topology: tpu7x:2x2x1
jax: 0.10.0
libtpu: 0.0.40
codegen_flags: <defaults>
</compile_context>

<pallas_src>
import functools

import jax
import jax.numpy as jnp
from jax.experimental import pallas as pl
from jax.experimental.pallas import tpu as pltpu


def rgcn_kernel(adj_ref, text_ref, w_ref, b_ref, out_ref, acc_ref, *,
                compute_dtype):
    # adj_ref : (1, 1, tm, N)   text_ref : (1, N, D)
    # w_ref   : (1, D, O)       b_ref    : (1, O)
    # out_ref : (1, tm, O)      acc_ref  : (tm, O) f32 VMEM scratch
    r = pl.program_id(2)

    @pl.when(r == 0)
    def _init():
        acc_ref[...] = jnp.zeros_like(acc_ref)

    a = adj_ref[0, 0]                                     # (tm, N) f32
    text = text_ref[0]                                    # (N, D)  f32

    # Row-normalization factor. Exact reciprocal, masked on empty rows
    # (equivalent to torch's r_inv[isinf(r_inv)] = 0).
    rowsum = jnp.sum(a, axis=1, keepdims=True)            # (tm, 1)
    r_inv = jnp.where(rowsum > 0.0, pl.reciprocal(rowsum), 0.0)

    # diag(r_inv) @ A @ X == r_inv * (A @ X): scale the (tm, D) matmul result
    # instead of the (tm, N) adjacency tile.
    hidden = r_inv * jnp.dot(a.astype(compute_dtype),
                             text.astype(compute_dtype),
                             preferred_element_type=jnp.float32)  # (tm, D) f32

    acc_ref[...] += jnp.dot(hidden.astype(compute_dtype),
                            w_ref[0].astype(compute_dtype),
                            preferred_element_type=jnp.float32)   # (tm, O) f32

    @pl.when(r == pl.num_programs(2) - 1)
    def _finish():
        out_ref[0] = (acc_ref[...] + b_ref[0]).astype(out_ref.dtype)


def relational_graph_conv(text, adj, weight, bias=None, *, row_tile=256,
                          compute_dtype=jnp.float32):
    """text: (B,N,D) f32, adj: (B,R,N,N) f32, weight: (R,D,O) f32, bias: (O,)."""
    B, N, D = text.shape
    _, R, _, _ = adj.shape
    O = weight.shape[-1]

    # Row-tile the destination-node axis: tm must divide N and respect the
    # (8, 128) layout rule (multiple of 8, or equal to the full dimension).
    tm = N
    if row_tile < N and N % row_tile == 0 and row_tile % 8 == 0:
        tm = row_tile
    n_m = N // tm

    if bias is None:
        bias = jnp.zeros((O,), dtype=jnp.float32)
    bias2d = bias.reshape(1, O).astype(jnp.float32)

    # TODO(synk): for O (or D) not a multiple of 128, pad to the next multiple
    # of 128 in the wrapper and slice after to keep stores lane-dense.

    kernel = functools.partial(rgcn_kernel, compute_dtype=compute_dtype)

    # Rough per-step VMEM budget (double-buffered inputs/outputs + scratch),
    # with 2x headroom, clamped so it is valid on every generation
    # (v7x physical VMEM is 64 MiB).
    est = 4 * (2 * tm * N + 2 * N * D + 2 * D * O + 2 * O + 2 * tm * O + tm * O)
    vmem_limit = int(min(max(2 * est, 8 << 20), 64 << 20))

    return pl.pallas_call(
        kernel,
        out_shape=jax.ShapeDtypeStruct((B, N, O), jnp.float32),
        grid=(B, n_m, R),
        in_specs=[
            pl.BlockSpec((1, 1, tm, N), lambda b, m, r: (b, r, m, 0)),  # adj
            pl.BlockSpec((1, N, D), lambda b, m, r: (b, 0, 0)),         # text
            pl.BlockSpec((1, D, O), lambda b, m, r: (r, 0, 0)),         # weight
            pl.BlockSpec((1, O), lambda b, m, r: (0, 0)),               # bias
        ],
        out_specs=pl.BlockSpec((1, tm, O), lambda b, m, r: (b, m, 0)),
        scratch_shapes=[pltpu.VMEM((tm, O), jnp.float32)],
        compiler_params=pltpu.CompilerParams(
            dimension_semantics=("parallel", "parallel", "arbitrary"),
            vmem_limit_bytes=vmem_limit,
        ),
    )(adj, text, weight, bias2d)


def reference(text, adj, weight, bias):
    """Pure-JAX reference mirroring the PyTorch forward."""
    B, N, D = text.shape
    R = adj.shape[1]
    O = weight.shape[-1]
    supports = []
    for r in range(R):
        a = adj[:, r]                                    # (B, N, N)
        rowsum = a.sum(axis=2)                           # (B, N)
        r_inv = 1.0 / rowsum
        r_inv = jnp.where(jnp.isinf(r_inv), 0.0, r_inv)
        a_norm = a * r_inv[:, :, None]
        supports.append(jnp.einsum("bij,bjd->bid", a_norm, text))
    tmp = jnp.concatenate(supports, axis=-1)             # (B, N, R*D)
    w = weight.reshape(R * D, O)
    return tmp @ w + bias


if __name__ == "__main__":
    # Lane-dense demo shapes: N, D, O multiples of (8, 128); row tile of 128
    # gives grid (B=2, row_tiles=2, R=3).
    B, R, N, D, O = 2, 3, 256, 128, 128

    key = jax.random.PRNGKey(0)
    k_text, k_adj, k_w, k_b = jax.random.split(key, 4)

    text = jax.random.normal(k_text, (B, N, D), dtype=jnp.float32)
    # Sparse-ish non-negative adjacency; force an all-zero row per relation
    # to exercise the inf -> 0 normalization path.
    adj_raw = jax.random.uniform(k_adj, (B, R, N, N), dtype=jnp.float32)
    adj = jnp.where(adj_raw > 0.7, adj_raw, 0.0)
    adj = adj.at[:, :, 0, :].set(0.0)

    # Deterministic synthetic parameter init (module leaves them uninitialized).
    weight = 0.1 * jax.random.normal(k_w, (R, D, O), dtype=jnp.float32)
    bias = 0.1 * jax.random.normal(k_b, (O,), dtype=jnp.float32)

    ref = reference(text, adj, weight, bias)

    # Full-f32 path: must match the reference tightly.
    out = relational_graph_conv(text, adj, weight, bias, row_tile=128)
    out = jax.block_until_ready(out)
    assert out.shape == (B, N, O)
    assert jnp.allclose(out, ref, atol=1e-3, rtol=1e-3), "f32 mismatch vs reference"

    # bf16 MXU operands / f32 accumulation (v6e/v7x peak-rate path): loose check.
    out_bf16 = relational_graph_conv(text, adj, weight, bias, row_tile=128,
                                     compute_dtype=jnp.bfloat16)
    out_bf16 = jax.block_until_ready(out_bf16)
    assert jnp.allclose(out_bf16, ref, atol=5e-2, rtol=5e-2), "bf16 mismatch vs reference"

    print("KERNEL_OK")
</pallas_src>

<mosaic_0001>
module attributes {stable_mosaic.version = 11 : i64} {
  func.func @rgcn_kernel(%arg0: i32, %arg1: i32, %arg2: i32, %arg3: memref<1x1x128x256xf32, #tpu.memory_space<vmem>>, %arg4: memref<1x256x128xf32, #tpu.memory_space<vmem>>, %arg5: memref<1x128x128xf32, #tpu.memory_space<vmem>>, %arg6: memref<1x128xf32, #tpu.memory_space<vmem>>, %arg7: memref<1x128x128xf32, #tpu.memory_space<vmem>>, %arg8: memref<128x128xf32, #tpu.memory_space<vmem>>) attributes {dimension_semantics = [#tpu.dimension_semantics<parallel>, #tpu.dimension_semantics<parallel>, #tpu.dimension_semantics<arbitrary>], iteration_bounds = array<i64: 2, 2, 3>, scalar_prefetch = 0 : i64, scratch_operands = 1 : i64, tpu.core_type = #tpu.core_type<tc>, window_params = [{transform_indices = @transform_0, window_bounds = array<i64: 1, 1, 128, 256>}, {transform_indices = @transform_1, window_bounds = array<i64: 1, 256, 128>}, {transform_indices = @transform_2, window_bounds = array<i64: 1, 128, 128>}, {pipeline_mode = #tpu.pipeline_mode<synchronous>, transform_indices = @transform_3, window_bounds = array<i64: 1, 128>}, {transform_indices = @transform_4, window_bounds = array<i64: 1, 128, 128>}]} {
    %c0_i32 = arith.constant 0 : i32
    %0 = arith.cmpi eq, %arg2, %c0_i32 : i32
    %1 = arith.extui %0 : i1 to i32
    %c0_i32_0 = arith.constant 0 : i32
    %2 = arith.cmpi ne, %1, %c0_i32_0 : i32
    scf.if %2 {
      %cst_19 = arith.constant 0.000000e+00 : f32
      %26 = vector.broadcast %cst_19 : f32 to vector<128x128xf32>
      %c0_20 = arith.constant 0 : index
      %c0_21 = arith.constant 0 : index
      %27 = vector.load %arg8[%c0_20, %c0_21] : memref<128x128xf32, #tpu.memory_space<vmem>>, vector<128x128xf32>
      tpu.vector_store %arg8[%c0_20, %c0_21], %26 {strides = array<i32>} : memref<128x128xf32, #tpu.memory_space<vmem>>, vector<128x128xf32>,
    } else {
    }
    %c0 = arith.constant 0 : index
    %c0_1 = arith.constant 0 : index
    %c0_2 = arith.constant 0 : index
    %c0_3 = arith.constant 0 : index
    %3 = vector.load %arg3[%c0, %c0_1, %c0_2, %c0_3] : memref<1x1x128x256xf32, #tpu.memory_space<vmem>>, vector<1x1x128x256xf32>
    %4 = vector.shape_cast %3 : vector<1x1x128x256xf32> to vector<128x256xf32>
    %c0_4 = arith.constant 0 : index
    %c0_5 = arith.constant 0 : index
    %c0_6 = arith.constant 0 : index
    %5 = vector.load %arg4[%c0_4, %c0_5, %c0_6] : memref<1x256x128xf32, #tpu.memory_space<vmem>>, vector<1x256x128xf32>
    %6 = vector.shape_cast %5 : vector<1x256x128xf32> to vector<256x128xf32>
    %cst = arith.constant dense<0.000000e+00> : vector<128xf32>
    %7 = vector.multi_reduction <add>, %4, %cst [1] : vector<128x256xf32> to vector<128xf32>
    %8 = vector.shape_cast %7 : vector<128xf32> to vector<128x1xf32>
    %cst_7 = arith.constant 0.000000e+00 : f32
    %9 = vector.broadcast %cst_7 : f32 to vector<128x1xf32>
    %10 = arith.cmpf ogt, %8, %9 : vector<128x1xf32>
    %11 = tpu.reciprocal %8 : vector<128x1xf32> -> vector<128x1xf32>
    %cst_8 = arith.constant 0.000000e+00 : f32
    %12 = vector.broadcast %cst_8 : f32 to vector<128x1xf32>
    %13 = arith.select %10, %11, %12 : vector<128x1xi1>, vector<128x1xf32>
    %cst_9 = arith.constant dense<0.000000e+00> : vector<128x128xf32>
    %14 = tpu.matmul %4, %6, %cst_9 {dimension_numbers = #tpu.dot_dimension_numbers<[1], [0], [0], [1], [0, 0, 1, 1], [], []>} : vector<128x256xf32>, vector<256x128xf32>, vector<128x128xf32> -> vector<128x128xf32>
    %15 = vector.broadcast %13 : vector<128x1xf32> to vector<128x128xf32>
    %16 = arith.mulf %15, %14 : vector<128x128xf32>
    %c0_10 = arith.constant 0 : index
    %c0_11 = arith.constant 0 : index
    %17 = vector.load %arg8[%c0_10, %c0_11] : memref<128x128xf32, #tpu.memory_space<vmem>>, vector<128x128xf32>
    %c0_12 = arith.constant 0 : index
    %c0_13 = arith.constant 0 : index
    %c0_14 = arith.constant 0 : index
    %18 = vector.load %arg5[%c0_12, %c0_13, %c0_14] : memref<1x128x128xf32, #tpu.memory_space<vmem>>, vector<1x128x128xf32>
    %19 = vector.shape_cast %18 : vector<1x128x128xf32> to vector<128x128xf32>
    %cst_15 = arith.constant dense<0.000000e+00> : vector<128x128xf32>
    %20 = tpu.matmul %16, %19, %cst_15 {dimension_numbers = #tpu.dot_dimension_numbers<[1], [0], [0], [1], [0, 0, 1, 1], [], []>} : vector<128x128xf32>, vector<128x128xf32>, vector<128x128xf32> -> vector<128x128xf32>
    %21 = arith.addf %17, %20 : vector<128x128xf32>
    %c0_16 = arith.constant 0 : index
    %c0_17 = arith.constant 0 : index
    %22 = vector.load %arg8[%c0_16, %c0_17] : memref<128x128xf32, #tpu.memory_space<vmem>>, vector<128x128xf32>
    tpu.vector_store %arg8[%c0_16, %c0_17], %21 {strides = array<i32>} : memref<128x128xf32, #tpu.memory_space<vmem>>, vector<128x128xf32>,
    %c2_i32 = arith.constant 2 : i32
    %23 = arith.cmpi eq, %arg2, %c2_i32 : i32
    %24 = arith.extui %23 : i1 to i32
    %c0_i32_18 = arith.constant 0 : i32
    %25 = arith.cmpi ne, %24, %c0_i32_18 : i32
    scf.if %25 {
      %c0_19 = arith.constant 0 : index
      %c0_20 = arith.constant 0 : index
      %26 = vector.load %arg8[%c0_19, %c0_20] : memref<128x128xf32, #tpu.memory_space<vmem>>, vector<128x128xf32>
      %c0_21 = arith.constant 0 : index
      %c0_22 = arith.constant 0 : index
      %27 = vector.load %arg6[%c0_21, %c0_22] : memref<1x128xf32, #tpu.memory_space<vmem>>, vector<1x128xf32>
      %28 = vector.shape_cast %27 : vector<1x128xf32> to vector<128xf32>
      %29 = vector.shape_cast %28 : vector<128xf32> to vector<1x128xf32>
      %30 = vector.broadcast %29 : vector<1x128xf32> to vector<128x128xf32>
      %31 = arith.addf %26, %30 : vector<128x128xf32>
      %c0_23 = arith.constant 0 : index
      %c0_24 = arith.constant 0 : index
      %c0_25 = arith.constant 0 : index
      %32 = vector.load %arg7[%c0_23, %c0_24, %c0_25] : memref<1x128x128xf32, #tpu.memory_space<vmem>>, vector<1x128x128xf32>
      %33 = vector.shape_cast %32 : vector<1x128x128xf32> to vector<128x128xf32>
      %34 = vector.shape_cast %31 : vector<128x128xf32> to vector<1x128x128xf32>
      tpu.vector_store %arg7[%c0_23, %c0_24, %c0_25], %34 {strides = array<i32>} : memref<1x128x128xf32, #tpu.memory_space<vmem>>, vector<1x128x128xf32>,
    } else {
    }
    return
  }
  func.func @transform_0(%arg0: i32, %arg1: i32, %arg2: i32) -> (i32, i32, i32, i32) {
    %c0_i32 = arith.constant 0 : i32
    %c0_i32_0 = arith.constant 0 : i32
    return %arg0, %arg2, %arg1, %c0_i32 : i32, i32, i32, i32
  }
  func.func @transform_1(%arg0: i32, %arg1: i32, %arg2: i32) -> (i32, i32, i32) {
    %c0_i32 = arith.constant 0 : i32
    %c0_i32_0 = arith.constant 0 : i32
    %c0_i32_1 = arith.constant 0 : i32
    return %arg0, %c0_i32, %c0_i32_0 : i32, i32, i32
  }
  func.func @transform_2(%arg0: i32, %arg1: i32, %arg2: i32) -> (i32, i32, i32) {
    %c0_i32 = arith.constant 0 : i32
    %c0_i32_0 = arith.constant 0 : i32
    %c0_i32_1 = arith.constant 0 : i32
    return %arg2, %c0_i32, %c0_i32_0 : i32, i32, i32
  }
  func.func @transform_3(%arg0: i32, %arg1: i32, %arg2: i32) -> (i32, i32) {
    %c0_i32 = arith.constant 0 : i32
    %c0_i32_0 = arith.constant 0 : i32
    %c0_i32_1 = arith.constant 0 : i32
    return %c0_i32, %c0_i32_0 : i32, i32
  }
  func.func @transform_4(%arg0: i32, %arg1: i32, %arg2: i32) -> (i32, i32, i32) {
    %c0_i32 = arith.constant 0 : i32
    %c0_i32_0 = arith.constant 0 : i32
    return %arg0, %arg1, %c0_i32 : i32, i32, i32
  }
}

</mosaic_0001>

<bundles_post_ra>
// kernel: tpu_custom_call.1
= control target key start
LH: loop header
LB: loop body
LE: loop exit
PB: predicated region body
PF: predicated region fallthrough
CT: control target
= control target key end

     0   :  { %s2648_s0 = inlined_call_operand.hbm [shape: f32[2,3,256,256], index: 0, kind: input, shape index: {}]   ;;  %s2649_s1 = inlined_call_operand.hbm [shape: f32[2,256,128], index: 1, kind: input, shape index: {}]   ;;  %s2650_s2 = inlined_call_operand.hbm [shape: f32[3,128,128], index: 2, kind: input, shape index: {}]   ;;  %s2651_s3 = inlined_call_operand.hbm [shape: f32[1,128], index: 3, kind: input, shape index: {}]   ;;  %s2652_s4 = inlined_call_operand.hbm [shape: f32[2,256,128], index: 4, kind: output, shape index: {}]  }
   0x1   :  { %2689 = sst [smem:[#allocation37_spill]] %s2649_s1 }
   0x2   :  { %2690 = sst [smem:[#allocation38_spill]] %s2650_s2 }
   0x3   :  { %2691 = sst [smem:[#allocation39_spill]] %s2651_s3 }
   0x4   :  { %2692 = sst [smem:[#allocation40_spill]] %s2652_s4 }
   0x5   :  { %9 = vsyncpa [#allocation4], 0 }
   0x6   :  { %11 = vsyncpa [#allocation4 + $0x1], 0 }
   0x7   :  { %12 = vsyncpa [#allocation7], 0 }
   0x8   :  { %14 = vsyncpa [#allocation7 + $0x1], 0 }
   0x9   :  { %15 = vsyncpa [#allocation10], 0 }
   0xa   :  { %16 = vsyncpa [#allocation5], 0 }
   0xb   :  { %18 = vsyncpa [#allocation5 + $0x1], 0  ;;  %s1962_s15 = smov 0   ;;  %s1964_s16 = smov 0  }
   0xc   :  { %s1966_s17 = smov 0   ;;  %s1968_s18 = smov 0  }
   0xd   :  { %s1970_s19 = smov 0   ;;  %s1972_s20 = smov 0  }
   0xe   :  { %s1974_s21 = smov 0   ;;  %s1976_s22 = smov 0  }
   0xf   :  { %s1978_s23 = smov 0   ;;  %s1980_s24 = smov 0  }
  0x10   :  { %s1982_s25 = smov 0   ;;  %s1984_s26 = smov 0  }
  0x11   :  { %s1986_s27 = smov 0   ;;  %s1988_s28 = smov 0  }
  0x12   :  { %s1990_s29 = smov 0   ;;  %s1992_s30 = smov 0  }
  0x13   :  { %s1994_s5 = smov 0   ;;  %s1996_s6 = smov 0  }
  0x14   :  { %s1998_s7 = smov 0  }
  0x15 LB: > { %2693 = sst [smem:[#allocation17_spill]] %s1851_s15  ;;  %p2655_p0 = scmp.eq.s32.totalorder %s1923_s7, 0  ;;  %s1923_s7 = sphi %s1998_s7, %s24_s7   ;;  %s1919_s6 = sphi %s1996_s6, %s2776_s6   ;;  %s1915_s5 = sphi %s1994_s5, %s2774_s5   ;;  %s1911_s30 = sphi %s1992_s30, %s2788_s30   ;;  %s1907_s29 = sphi %s1990_s29, %s2771_s29   ;;  %s1903_s28 = sphi %s1988_s28, %s2787_s28   ;;  %s1899_s27 = sphi %s1986_s27, %s2786_s27   ;;  %s1895_s26 = sphi %s1984_s26, %s2785_s26   ;;  %s1891_s25 = sphi %s1982_s25, %s2784_s25   ;;  %s1887_s24 = sphi %s1980_s24, %s2783_s24   ;;  %s1883_s23 = sphi %s1978_s23, %s2782_s23   ;;  %s1879_s22 = sphi %s1976_s22, %s2781_s22   ;;  %s1875_s21 = sphi %s1974_s21, %s2767_s21   ;;  %s1871_s20 = sphi %s1972_s20, %s2780_s20   ;;  %s1867_s19 = sphi %s1970_s19, %s2779_s19   ;;  %s1863_s18 = sphi %s1968_s18, %s2778_s18   ;;  %s1859_s17 = sphi %s1966_s17, %s2777_s17   ;;  %s1855_s16 = sphi %s1964_s16, %s2775_s16   ;;  %s1851_s15 = sphi %s1962_s15, %s2773_s15  }
  0x16   : > { %2694 = sst [smem:[#allocation18_spill]] %s1855_s16  ;;  %p87_p1 = scmp.ne.s32.totalorder %s1883_s23, %s1879_s22 }
  0x17   : > { %2695 = sst [smem:[#allocation19_spill]] %s1879_s22  ;;  %p2654_p2 = scmp.lt.s32.totalorder %s1923_s7, 12 }
  0x18   : > { %2696 = sst [smem:[#allocation20_spill]] %s1891_s25  ;;  %p89_p3 = por %p87_p1, %p2655_p0 }
  0x19   : > { %2697 = sst [smem:[#allocation21_spill]] %s1899_s27  ;;  %s229_s10 = sand.u32 1, %s1923_s7  }
  0x1a   : > { %2698 = sst [smem:[#allocation22_spill]] %s1903_s28  ;;  %s231_s11 = sand.u32 1, %s1883_s23  }
  0x1b   : > { %2699 = sst [smem:[#allocation23_spill]] %s1907_s29  ;;  %s1124_s12 = sshll.u32 %s231_s11, 8 }
  0x1c   : > { %2700 = sst [smem:[#allocation24_spill]] %s1915_s5  ;;  %s1146_s13 = sshll.u32 %s1919_s6, 12 }
  0x1d   : > { %2701 = sst [smem:[#allocation25_spill]] %s1919_s6  ;;  %s233_s8 = scalar_lea.vmem [#allocation6], %s1124_s12 }
  0x1e   : > { %s2702_s1 = sld [smem:[#allocation37_spill]]  ;;  %s240_s28 = sshll.u32 %s233_s8, 4  ;;  %s2079_s28 = int_to_ptr.vmem [resolvable:$true] %s240_s28 }
  0x1f   : > { %p2075_p4 = pnand %p2654_p2, %p89_p3  ;;  %s2081_s11 = scalar_lea.sflag [#allocation7], %s229_s10 }
  0x20   : > { %2704 = sst [smem:[#allocation26_spill]] %s2081_s11 }
  0x21   : > { %p1609_p6 = pneg %p2075_p4 }
  0x24   : > { %s2071_s29 = scalar_lea.hbm %s2702_s1, %s1146_s13  ;;  %s1612_s13 = scalar_lea.hbm %s2702_s1, 8192 }
  0x25   : > { %s1607_s4 = scalar_lea.hbm %s2071_s29, 4096  ;;  %p1613_p9 = scmp.lt.u32.totalorder %s2071_s29, %s2702_s1 }
  0x26   : > { %p1608_p5 = scmp.ne.s32.totalorder %s2071_s29, %s1607_s4  ;;  %p1614_p10 = scmp.lt.u32.totalorder %s1612_s13, %s1607_s4 }
  0x27   : > { %p1616_p12 = scmp.lt.u32.totalorder %s1607_s4, %s2071_s29 }
  0x28   : > { %p1610_p7 = pnand %p1609_p6, %p1608_p5  ;;  %p1615_p11 = por %p1614_p10, %p1613_p9 }
  0x2a   : > { %p1611_p8 = pneg %p1610_p7  ;;  %p1617_p13 = por %p1616_p12, %p1615_p11 }
  0x2c   : > { %p1618_p1 = pnand %p1617_p13, %p1611_p8 }
  0x2e   : > { %1621 = shalt.err (!%p1618_p1)
}
  0x2f   : > { %s1622_s10 = scalar_lea.vmem %s2079_s28, 4096  ;;  %s1925_s8 = smov [#allocation6]  }
  0x30   : > { %p1623_p3 = scmp.ne.s32.totalorder %s2079_s28, %s1622_s10  ;;  %s1627_s12 = sshll.u32 %s1925_s8, 4  ;;  %s1628_s12 = int_to_ptr.vmem [resolvable:$false] %s1627_s12 }
  0x31   : > { %s1629_s27 = scalar_lea.vmem %s1628_s12, 8192  ;;  %p1630_p2 = scmp.lt.s32.totalorder %s2079_s28, %s1628_s12 }
  0x32   : > { %p1625_p5 = pnand %p1623_p3, %p1609_p6  ;;  %p1631_p9 = scmp.lt.s32.totalorder %s1629_s27, %s1622_s10 }
  0x34   : > { %p1626_p7 = pneg %p1625_p5  ;;  %p1632_p10 = por %p1631_p9, %p1630_p2 }
  0x36   : > { %p1633_p11 = pnand %p1632_p10, %p1626_p7 }
  0x38   : > { %1636 = shalt.err (!%p1633_p11)
}
  0x39   : > { %s2656_s4 = smov 128   ;;  %s2657_s13 = smov 8  }
  0x3a   : > { %1403 = dma.hbm_to_vmem [thread:$0]  (!%p2075_p4), %s2071_s29, 4096, %s2079_s28, %s2081_s11, %s2656_s4, %s2656_s4, %s2657_s13  }
  0x3b   : > { %s2113_s14 = sadd.s32 4294967295, %s1923_s7   ;;  %s1115_s10 = sadd.s32 4294967294, %s1923_s7  }
  0x3c   : > { %2705 = sst [smem:[#allocation27_spill]] %s2113_s14  ;;  %p67_p2 = scmp.ne.s32.totalorder %s1891_s25, %s1887_s24 }
  0x3d   : > { %p2664_p6 = scmp.eq.s32.totalorder %s2113_s14, 0  ;;  %p93_p8 = scmp.ne.s32.totalorder %s1879_s22, %s1875_s21 }
  0x3e   : > { %p119_p12 = scmp.ne.s32.totalorder %s1867_s19, %s1863_s18  ;;  %p165_p3 = scmp.ne.s32.totalorder %s1859_s17, %s1855_s16 }
  0x3f   : > { %p2125_p13 = por %p2664_p6, %p67_p2  ;;  %p2132_p4 = por %p93_p8, %p2664_p6 }
  0x40   : > { %p2138_p1 = por %p119_p12, %p2664_p6  ;;  %p166_p5 = scmp.eq.s32.totalorder %s2113_s14, 11 }
  0x41   : > { %s2706_s9 = scalar_select %p2125_p13, 1, 0 }
  0x42   : > { %s2708_s29 = scalar_select %p2132_p4, 1, 0 }
  0x43   : > { %2707 = sst [smem:[#allocation28_spill]] %s2706_s9  ;;  %p171_p7 = scmp.ne.s32.totalorder %s1855_s16, %s1851_s15 }
  0x44   : > { %2709 = sst [smem:[#allocation29_spill]] %s2708_s29  ;;  %p172_p9 = scmp.eq.s32.totalorder %s1115_s10, 11 }
  0x45   : > { %s2710_s8 = scalar_select %p2138_p1, 1, 0 }
  0x46   : > { %p2147_p10 = por %p166_p5, %p165_p3  ;;  %p1116_p11 = scmp.ge.s32.totalorder %s1923_s7, 1 }
  0x47   : > { %2711 = sst [smem:[#allocation30_spill]] %s2710_s8  ;;  %p2152_p2 = por %p172_p9, %p171_p7 }
  0x48   : > { %s2712_s18 = scalar_select %p2147_p10, 1, 0 }
  0x49   : > { %s2714_s21 = scalar_select %p2152_p2, 1, 0 }
  0x4a   : > { %2713 = sst [smem:[#allocation31_spill]] %s2712_s18  ;;  %p179_p8 = scmp.lt.s32.totalorder %s1923_s7, 13 }
  0x4b   : > { %2715 = sst [smem:[#allocation32_spill]] %s2714_s21  ;;  %s1928_s12 = smov [#allocation9]  }
  0x4c   : > { %p2157_p0 = pnand %p1116_p11, %p179_p8  ;;  %s192_s27 = sshll.u32 %s1928_s12, 4  ;;  %s193_s27 = int_to_ptr.vmem [resolvable:$true] %s192_s27 }
  0x4d   : > { %s36_s4 = sadd.s32 1, %s1911_s30  ;;  %s2720_s3 = sld [smem:[#allocation39_spill]] }
  0x4e   : > { %s2716_s24 = scalar_select %p2157_p0, 1, 0 }
  0x4f   : > { %p1393_p12 = pneg %p2157_p0  ;;  %p2170_p5 = scmp.ge.s32.totalorder %s36_s4, 3 }
  0x50   : > { %2717 = sst [smem:[#allocation33_spill]] %s2716_s24 }
  0x51   : > { %p2165_p3 = pnand %p1393_p12, %p2664_p6 }
  0x52   : > { %s2719_s13 = scalar_select %p2170_p5, 1, 0 }
  0x53   : > { %s1637_s21 = scalar_lea.hbm %s2720_s3, 16  ;;  %p1639_p9 = pneg %p2165_p3 }
  0x54   : > { %p1638_p7 = scmp.ne.s32.totalorder %s2720_s3, %s1637_s21  ;;  %p1644_p12 = scmp.lt.u32.totalorder %s1637_s21, %s2720_s3 }
  0x56   : > { %p1640_p11 = pnand %p1639_p9, %p1638_p7 }
  0x58   : > { %p1641_p8 = pneg %p1640_p11 }
  0x5a   : > { %p1646_p6 = pnand %p1644_p12, %p1641_p8 }
  0x5c   : > { %1649 = shalt.err (!%p1646_p6)
}
  0x5d   : > { %s1650_s8 = scalar_lea.vmem %s193_s27, 16  ;;  %s1657_s1 = scalar_lea.vmem %s193_s27, 32 }
  0x5e   : > { %p1651_p2 = scmp.ne.s32.totalorder %s193_s27, %s1650_s8  ;;  %p1658_p4 = scmp.lt.s32.totalorder %s193_s27, %s193_s27 }
  0x5f   : > { %p1659_p13 = scmp.lt.s32.totalorder %s1657_s1, %s1650_s8 }
  0x60   : > { %p1653_p10 = pnand %p1651_p2, %p1639_p9 }
  0x61   : > { %p1660_p0 = por %p1659_p13, %p1658_p4 }
  0x62   : > { %p1654_p1 = pneg %p1653_p10 }
  0x64   : > { %p1661_p5 = pnand %p1660_p0, %p1654_p1 }
  0x66   : > { %1664 = shalt.err (!%p1661_p5)
}
  0x67   : > { %1396 = dma.hbm_to_vmem [thread:$0]  (!%p2165_p3), %s2720_s3, 16, %s193_s27, [#allocation10]  }
  0x68   : > { %p2721_p0 = scmp.ne.s32.totalorder %s2719_s13, 0  ;;  %s39_s16 = sadd.s32 1, %s1915_s5 }
  0x69   : > { %s54_s8 = sadd.s32 1, %s1895_s26  ;;  %p61_p6 = scmp.ne.s32.totalorder %s1895_s26, %s1891_s25 }
  0x6a   : > { %s2790_s4 = smov (%p2721_p0, %s36_s4), 0  ;;  %s2792_s16 = smov (!%p2721_p0, %s39_s16), %s1915_s5 }
  0x6b   : > { %2722 = sst [smem:[#allocation34_spill]] %s2790_s4  ;;  %s2201_s18 = ssub.s32 %s1911_s30, %s2790_s4 }
  0x6c   : > { %p41_p13 = scmp.ge.s32.totalorder %s2792_s16, 2  ;;  %p104_p4 = scmp.eq.s32.totalorder %s2201_s18, 0 }
  0x6d   : > { %p2723_p1 = scmp.eq.s32.totalorder %s1923_s7, 0  ;;  %s203_s27 = sand.u32 1, %s1895_s26  }
  0x6e   : > { %s2794_s16 = smov (%p41_p13, %s2792_s16), 0  ;;  %s2726_s10 = sadd.s32 1, %s1919_s6 }
  0x6f   : > { %p2208_p10 = por %p2723_p1, %p61_p6  ;;  %2725 = sst [smem:[#allocation35_spill]] %s2794_s16 }
  0x70   : > { %s2796_s10 = smov (!%p41_p13, %s2726_s10), %s1919_s6  ;;  %s50_s13 = ssub.s32 %s1915_s5, %s2794_s16 }
  0x71   : > { %p45_p2 = scmp.ge.s32.totalorder %s2796_s10, 2  ;;  %s1119_s12 = sshll.u32 %s203_s27, 8 }
  0x72   : > { %s1145_s1 = sshll.u32 %s1915_s5, 5  ;;  %s1122_s15 = sshll.u32 %s1911_s30, 6 }
  0x73   : > { %s2798_s10 = smov (%p45_p2, %s2796_s10), 0  ;;  %s1380_s28 = smul.u32 192, %s1919_s6 }
  0x74   : > { %2727 = sst [smem:[#allocation36_spill]] %s2798_s10  ;;  %s47_s3 = ssub.s32 %s1919_s6, %s2798_s10 }
  0x75   : > { %s214_s4 = sadd.s32 %s1145_s1, %s1122_s15  ;;  %s49_s29 = sor.u32 %s2201_s18, %s47_s3 }
  0x76   : > { %p78_p3 = scmp.eq.s32.totalorder %s47_s3, 0  ;;  %s51_s22 = sor.u32 %s50_s13, %s49_s29 }
  0x77   : > { %s152_s14 = sor.u32 %s50_s13, %s47_s3  ;;  %p52_p5 = scmp.eq.s32.totalorder %s51_s22, 0 }
  0x78   : > { %p153_p7 = scmp.eq.s32.totalorder %s152_s14, 0  ;;  %s2728_s16 = sadd.s32 1, %s1883_s23 }
  0x79   : > { %s2231_s9 = scalar_select %p78_p3, %s1883_s23, %s2728_s16  }
  0x7a   : > { %s2234_s25 = scalar_select %p52_p5, %s1895_s26, %s54_s8  }
  0x7b   : > { %s2729_s5 = sadd.s32 1, %s1859_s17  ;;  %s216_s11 = sadd.s32 %s1380_s28, %s214_s4 }
  0x7c   : > { %s2239_s24 = scalar_select %p153_p7, %s1859_s17, %s2729_s5  }
  0x7d   : > { %s207_s2 = scalar_lea.vmem [#allocation3], %s1119_s12  ;;  %s1123_s1 = sshll.u32 %s216_s11, 7 }
  0x7e   : > { %s219_s10 = sshll.u32 %s207_s2, 4  ;;  %s2246_s3 = scalar_lea.hbm %s2648_s0, %s1123_s1  ;;  %s2241_s10 = int_to_ptr.vmem [resolvable:$true] %s219_s10 }
  0x7f   : > { %p2730_p9 = scmp.lt.s32.totalorder %s1923_s7, 12  ;;  %s2256_s2 = scalar_lea.sflag [#allocation4], %s203_s27 }
  0x80   : > { %s1665_s5 = scalar_lea.hbm %s2246_s3, 4096  ;;  %s1670_s4 = scalar_lea.hbm %s2648_s0, 49152 }
  0x81   : > { %p2252_p11 = pnand %p2730_p9, %p2208_p10  ;;  %p1666_p8 = scmp.ne.s32.totalorder %s2246_s3, %s1665_s5 }
  0x82   : > { %p1671_p13 = scmp.lt.u32.totalorder %s2246_s3, %s2648_s0  ;;  %p1672_p1 = scmp.lt.u32.totalorder %s1670_s4, %s1665_s5 }
  0x83   : > { %p1667_p12 = pneg %p2252_p11  ;;  %p1674_p2 = scmp.lt.u32.totalorder %s1665_s5, %s2246_s3 }
  0x84   : > { %p1673_p10 = por %p1672_p1, %p1671_p13 }
  0x85   : > { %p1668_p0 = pnand %p1667_p12, %p1666_p8 }
  0x86   : > { %p1675_p3 = por %p1674_p2, %p1673_p10 }
  0x87   : > { %p1669_p6 = pneg %p1668_p0 }
  0x89   : > { %p1676_p5 = pnand %p1675_p3, %p1669_p6 }
  0x8b   : > { %1679 = shalt.err (!%p1676_p5)
}
  0x8c   : > { %s1680_s16 = scalar_lea.vmem %s2241_s10, 4096  ;;  %s1929_s8 = smov [#allocation3]  }
  0x8d   : > { %p1681_p7 = scmp.ne.s32.totalorder %s2241_s10, %s1680_s16  ;;  %s1685_s21 = sshll.u32 %s1929_s8, 4  ;;  %s1686_s21 = int_to_ptr.vmem [resolvable:$false] %s1685_s21 }
  0x8e   : > { %s1687_s27 = scalar_lea.vmem %s1686_s21, 8192  ;;  %p1688_p0 = scmp.lt.s32.totalorder %s2241_s10, %s1686_s21 }
  0x8f   : > { %p1683_p9 = pnand %p1681_p7, %p1667_p12  ;;  %p1689_p13 = scmp.lt.s32.totalorder %s1687_s27, %s1680_s16 }
  0x91   : > { %p1684_p8 = pneg %p1683_p9  ;;  %p1690_p1 = por %p1689_p13, %p1688_p0 }
  0x93   : > { %p1691_p10 = pnand %p1690_p1, %p1684_p8 }
  0x95   : > { %1694 = shalt.err (!%p1691_p10)
}
  0x96   : > { %s1930_s13 = smov 256   ;;  %s1931_s12 = smov 16  }
  0x97   : > { %1400 = dma.hbm_to_vmem [thread:$0]  (!%p2252_p11), %s2246_s3, 4096, %s2241_s10, %s2256_s2, %s1930_s13, %s1930_s13, %s1931_s12  }
  0x98   : > { %s1147_s28 = sshll.u32 %s1911_s30, 11  ;;  %s106_s1 = sadd.s32 1, %s1871_s20 }
  0x99   : > { %p113_p12 = scmp.ne.s32.totalorder %s1871_s20, %s1867_s19  ;;  %p2732_p6 = scmp.eq.s32.totalorder %s1923_s7, 0 }
  0x9a   : > { %s2291_s15 = scalar_select %p104_p4, %s1871_s20, %s106_s1  }
  0x9b   : > { %p115_p2 = por %p113_p12, %p2732_p6  ;;  %s252_s5 = sand.u32 1, %s1871_s20  }
  0x9c   : > { %s1127_s6 = sshll.u32 %s252_s5, 7  ;;  %s2733_s14 = sld [smem:[#allocation38_spill]] }
  0x9d   : > { %p2734_p3 = scmp.lt.s32.totalorder %s1923_s7, 12  ;;  %s254_s18 = scalar_lea.vmem [#allocation8], %s1127_s6 }
  0x9e   : > { %s261_s3 = sshll.u32 %s254_s18, 4  ;;  %s2307_s3 = int_to_ptr.vmem [resolvable:$true] %s261_s3 }
  0x9f   : > { %p2303_p11 = pnand %p2734_p3, %p115_p2 }
  0xa1   : > { %p1697_p5 = pneg %p2303_p11 }
  0xa2   : > { %s2299_s29 = scalar_lea.hbm %s2733_s14, %s1147_s28  ;;  %s1700_s8 = scalar_lea.hbm %s2733_s14, 6144 }
  0xa3   : > { %s1695_s22 = scalar_lea.hbm %s2299_s29, 2048  ;;  %p1701_p8 = scmp.lt.u32.totalorder %s2299_s29, %s2733_s14 }
  0xa4   : > { %p1696_p4 = scmp.ne.s32.totalorder %s2299_s29, %s1695_s22  ;;  %p1702_p0 = scmp.lt.u32.totalorder %s1700_s8, %s1695_s22 }
  0xa5   : > { %p1704_p1 = scmp.lt.u32.totalorder %s1695_s22, %s2299_s29 }
  0xa6   : > { %p1698_p7 = pnand %p1697_p5, %p1696_p4  ;;  %p1703_p13 = por %p1702_p0, %p1701_p8 }
  0xa8   : > { %p1699_p9 = pneg %p1698_p7  ;;  %p1705_p10 = por %p1704_p1, %p1703_p13 }
  0xaa   : > { %p1706_p12 = pnand %p1705_p10, %p1699_p9 }
  0xac   : > { %1709 = shalt.err (!%p1706_p12)
}
  0xad   : > { %s1710_s13 = scalar_lea.vmem %s2307_s3, 2048  ;;  %s1932_s12 = smov [#allocation8]  }
  0xae   : > { %p1711_p6 = scmp.ne.s32.totalorder %s2307_s3, %s1710_s13  ;;  %s1715_s28 = sshll.u32 %s1932_s12, 4  ;;  %s1716_s28 = int_to_ptr.vmem [resolvable:$false] %s1715_s28 }
  0xaf   : > { %s1717_s1 = scalar_lea.vmem %s1716_s28, 4096  ;;  %p1718_p4 = scmp.lt.s32.totalorder %s2307_s3, %s1716_s28 }
  0xb0   : > { %p1713_p2 = pnand %p1711_p6, %p1697_p5  ;;  %p1719_p7 = scmp.lt.s32.totalorder %s1717_s1, %s1710_s13 }
  0xb2   : > { %p1714_p3 = pneg %p1713_p2  ;;  %p1720_p8 = por %p1719_p7, %p1718_p4 }
  0xb4   : > { %p1721_p0 = pnand %p1720_p8, %p1714_p3 }
  0xb6   : > { %1724 = shalt.err (!%p1721_p0)
}
  0xb7   : > { %s2736_s5 = smov 8   ;;  %s2737_s6 = smov 128  }
  0xb8   : > { %s2738_s11 = sld [smem:[#allocation26_spill]]  ;;  %s2739_s4 = sld [smem:[#allocation33_spill]] }
  0xbe   : > { %1406 = dma.hbm_to_vmem [thread:$0]  (!%p2303_p11), %s2299_s29, 2048, %s2307_s3, %s2738_s11, %s2737_s6, %s2737_s6, %s2736_s5  }
  0xbf   : > { %p2740_p5 = scmp.ne.s32.totalorder %s2739_s4, 0 }
  0xc0   : > { %s2741_s18 = sld [smem:[#allocation20_spill]] (!%p2740_p5)  ;;  %s2742_s22 = sld [smem:[#allocation28_spill]] (!%p2740_p5) }
  0xc1   : > { %273 = sbr.rel (%p2740_p5) target bundleno = 809 (0x329), region = 36 }
  0xc6   : > { %s275_s2 = sand.u32 (!%p2740_p5), 1, %s2741_s18   ;;  %p2743_p9 = scmp.ne.s32.totalorder (!%p2740_p5), %s2742_s22, 0 }
  0xc7   : > { %s1131_s16 = sshll.u32 (!%p2740_p5), %s275_s2, 8  ;;  %s276_s8 = scalar_lea.sflag (!%p2740_p5), [#allocation4], %s275_s2 }
  0xc8   : > { %s2341_s21 = scalar_lea.vmem [#allocation3], %s1131_s16 }
  0xc9   : > { %1830 = dma.done.wait (%p2743_p9), %s276_s8, 4096  }
  0xca   : > { %1832 = vsyncadd (%p2743_p9), %s276_s8, 4294963200  ;;  %s2744_s10 = sld [smem:[#allocation27_spill]]  ;;  %s2745_s27 = sld [smem:[#allocation19_spill]] }
  0xcb   : > { %s2746_s13 = sld [smem:[#allocation29_spill]] }
  0xd0   : > { %s284_s12 = sand.u32 1, %s2744_s10   ;;  %s286_s29 = sand.u32 1, %s2745_s27  }
  0xd1   : > { %s1132_s3 = sshll.u32 %s286_s29, 8  ;;  %s285_s28 = scalar_lea.sflag [#allocation7], %s284_s12 }
  0xd2   : > { %s2349_s1 = scalar_lea.vmem [#allocation6], %s1132_s3  ;;  %p2747_p11 = scmp.ne.s32.totalorder %s2746_s13, 0 }
  0xd4   : > { %1834 = dma.done.wait (%p2747_p11), %s285_s28, 4096  }
  0xd5   : > { %1836 = vsyncadd (%p2747_p11), %s285_s28, 4294963200  ;;  %s2748_s5 = sld [smem:[#allocation30_spill]]  ;;  %s295_s6 = sand.u32 1, %s1867_s19  }
  0xd6   : > { %s1133_s11 = sshll.u32 %s295_s6, 7 }
  0xd7   : > { %s2356_s4 = scalar_lea.vmem [#allocation8], %s1133_s11 }
  0xdb   : > { %p2749_p13 = scmp.ne.s32.totalorder %s2748_s5, 0 }
  0xdd   : > { %1838 = dma.done.wait (%p2749_p13), %s285_s28, 2048  }
  0xde   : > { %1840 = vsyncadd (%p2749_p13), %s285_s28, 4294965248  ;;  %p2750_p1 = scmp.eq.s32.totalorder %s2744_s10, 0 }
  0xe0   : > { %1842 = dma.done.wait (%p2750_p1), [#allocation10], 16   ;;  %p2751_p10 = pmov %p2750_p1 }
  0xe1   : > { %s2752_s18 = sld [smem:[#allocation18_spill]]  ;;  %s2753_s8 = sld [smem:[#allocation21_spill]] }
  0xe2   : > { %1844 = vsyncadd (%p2751_p10), [#allocation10], 4294967280 }
  0xe7   : > { %s333_s22 = sand.u32 1, %s2752_s18   ;;  %p1136_p12 = scmp.ne.s32.totalorder %s2753_s8, 0 }
  0xe8   : > { %s1135_s2 = sshll.u32 %s333_s22, 7  ;;  %v1933_v0 = vmov (!%p1136_p12), 0.0  }
  0xe9   : > { %s2369_s16 = scalar_lea.vmem [#allocation11], %s1135_s2  ;;  %341 = sbr.rel (%p1136_p12) target bundleno = 241 (0xf1), region = 56  ;;  %342 = vst [vmem:[#allocation2] sm:$0xff] (!%p1136_p12), %v1933_v0  ;;  %343 = vst [vmem:[#allocation2 + $0x8] sm:$0xff] (!%p1136_p12), %v1933_v0 }
  0xea   : > { %344 = vst [vmem:[#allocation2 + $0x10] sm:$0xff] (!%p1136_p12), %v1933_v0  ;;  %345 = vst [vmem:[#allocation2 + $0x18] sm:$0xff] (!%p1136_p12), %v1933_v0 }
  0xeb   : > { %346 = vst [vmem:[#allocation2 + $0x20] sm:$0xff] (!%p1136_p12), %v1933_v0  ;;  %347 = vst [vmem:[#allocation2 + $0x28] sm:$0xff] (!%p1136_p12), %v1933_v0 }
  0xec   : > { %348 = vst [vmem:[#allocation2 + $0x30] sm:$0xff] (!%p1136_p12), %v1933_v0  ;;  %349 = vst [vmem:[#allocation2 + $0x38] sm:$0xff] (!%p1136_p12), %v1933_v0 }
  0xed   : > { %350 = vst [vmem:[#allocation2 + $0x40] sm:$0xff] (!%p1136_p12), %v1933_v0  ;;  %351 = vst [vmem:[#allocation2 + $0x48] sm:$0xff] (!%p1136_p12), %v1933_v0 }
  0xee   : > { %352 = vst [vmem:[#allocation2 + $0x50] sm:$0xff] (!%p1136_p12), %v1933_v0  ;;  %353 = vst [vmem:[#allocation2 + $0x58] sm:$0xff] (!%p1136_p12), %v1933_v0 }
  0xef   : > { %354 = vst [vmem:[#allocation2 + $0x60] sm:$0xff] (!%p1136_p12), %v1933_v0  ;;  %355 = vst [vmem:[#allocation2 + $0x68] sm:$0xff] (!%p1136_p12), %v1933_v0 }
  0xf0   : > { %356 = vst [vmem:[#allocation2 + $0x70] sm:$0xff] %v1933_v0  ;;  %357 = vst [vmem:[#allocation2 + $0x78] sm:$0xff] %v1933_v0 }
  0xf1 PF: > { %v406_v1 = vld [vmem:[%s2349_s1 + $0x80] sm:$0xff]  ;;  %v407_v2 = vld [vmem:[%s2349_s1 + $0x88] sm:$0xff]  ;;  %v408_v6 = vld [vmem:[%s2349_s1 + $0x90] sm:$0xff] }
  0xf2   : > { %v390_v3 = vld [vmem:[%s2349_s1] sm:$0xff]  ;;  %v1316_v4 = vpack.c.bf16 %v407_v2, %v406_v1  ;;  %v391_v5 = vld [vmem:[%s2349_s1 + $0x8] sm:$0xff]  ;;  %v409_v7 = vld [vmem:[%s2349_s1 + $0x98] sm:$0xff] }
  0xf3   : > { %v1318_v8 = vpack.c.bf16 %v391_v5, %v390_v3  ;;  %v1320_v9 = vpack.c.bf16 %v409_v7, %v408_v6  ;;  %v392_v10 = vld [vmem:[%s2349_s1 + $0x10] sm:$0xff]  ;;  %v393_v11 = vld [vmem:[%s2349_s1 + $0x18] sm:$0xff]  ;;  %v410_v12 = vld [vmem:[%s2349_s1 + $0xa0] sm:$0xff] }
  0xf4   : > { %1317 = vmatprep.subr.bf16.mxu0 %v1316_v4  ;;  %v411_v13 = vld [vmem:[%s2349_s1 + $0xa8] sm:$0xff]  ;;  %v1322_v14 = vpack.c.bf16 %v393_v11, %v392_v10  ;;  %v394_v16 = vld [vmem:[%s2349_s1 + $0x20] sm:$0xff]  ;;  %v412_v18 = vld [vmem:[%s2349_s1 + $0xb0] sm:$0xff] }
  0xf5   : > { %1319 = vmatpush3.bf16.msra.mxu0 %v1318_v8  ;;  %v1324_v15 = vpack.c.bf16 %v411_v13, %v410_v12  ;;  %v395_v17 = vld [vmem:[%s2349_s1 + $0x28] sm:$0xff]  ;;  %v413_v19 = vld [vmem:[%s2349_s1 + $0xb8] sm:$0xff]  ;;  %v396_v22 = vld [vmem:[%s2349_s1 + $0x30] sm:$0xff] }
  0xf6   : > { %1321 = vmatprep.subr.bf16.mxu0 %v1320_v9  ;;  %v1326_v20 = vpack.c.bf16 %v395_v17, %v394_v16  ;;  %v1328_v21 = vpack.c.bf16 %v413_v19, %v412_v18  ;;  %v397_v23 = vld [vmem:[%s2349_s1 + $0x38] sm:$0xff]  ;;  %v414_v24 = vld [vmem:[%s2349_s1 + $0xc0] sm:$0xff]  ;;  %v415_v25 = vld [vmem:[%s2349_s1 + $0xc8] sm:$0xff] }
  0xf7   : > { %v359_v26 = vld [vmem:[%s2341_s21 + $0x8] sm:$0xff]  ;;  %v398_v27 = vld [vmem:[%s2349_s1 + $0x40] sm:$0xff]  ;;  %v1330_v29 = vpack.c.bf16 %v397_v23, %v396_v22  ;;  %v1332_v34 = vpack.c.bf16 %v415_v25, %v414_v24  ;;  %v416_v35 = vld [vmem:[%s2349_s1 + $0xd0] sm:$0xff] }
  0xf8   : > { %582 = vmatprep.mubr.f32.mxu0 %v359_v26  ;;  %v2393_v28 = vld [vmem:[%s2341_s21] sm:$0xff]  ;;  %v399_v30 = vld [vmem:[%s2349_s1 + $0x48] sm:$0xff]  ;;  %v2405_v36 = vld [vmem:[%s2341_s21 + $0x18] sm:$0xff] }
  0xf9   : > { %1323 = vmatpush3.bf16.msra.mxu0 %v1322_v14  ;;  %v2397_v31 = vld [vmem:[%s2341_s21 + $0x28] sm:$0xff]  ;;  %v2400_v32 = vld [vmem:[%s2341_s21 + $0x20] sm:$0xff]  ;;  %v422_v33 = vadd.f32 %v359_v26, %v2393_v28  ;;  %v2408_v37 = vld [vmem:[%s2341_s21 + $0x10] sm:$0xff]  ;;  %v1334_v44 = vpack.c.bf16 %v399_v30, %v398_v27 }
  0xfa   : > { %1325 = vmatprep.subr.bf16.mxu0 %v1324_v15  ;;  %v428_v38 = vadd.f32 %v2397_v31, %v2400_v32  ;;  %v417_v39 = vld [vmem:[%s2349_s1 + $0xd8] sm:$0xff]  ;;  %v2417_v41 = vld [vmem:[%s2341_s21 + $0x30] sm:$0xff]  ;;  %v425_v42 = vadd.f32 %v2405_v36, %v2408_v37  ;;  %v418_v48 = vld [vmem:[%s2349_s1 + $0xe0] sm:$0xff] }
  0xfb   : > { %v2414_v40 = vld [vmem:[%s2341_s21 + $0x38] sm:$0xff]  ;;  %423 = vadd.xlane.f32.xlu0 %v422_v33  ;;  %v400_v45 = vld [vmem:[%s2349_s1 + $0x50] sm:$0xff]  ;;  %v1336_v47 = vpack.c.bf16 %v417_v39, %v416_v35  ;;  %v2427_v49 = vld [vmem:[%s2341_s21 + $0x48] sm:$0xff] }
  0xfc   : > { %429 = vadd.xlane.f32.xlu1 %v428_v38  ;;  %v431_v43 = vadd.f32 %v2414_v40, %v2417_v41  ;;  %v401_v46 = vld [vmem:[%s2349_s1 + $0x58] sm:$0xff]  ;;  %v2430_v50 = vld [vmem:[%s2341_s21 + $0x40] sm:$0xff]  ;;  %v419_v51 = vld [vmem:[%s2349_s1 + $0xe8] sm:$0xff] }
  0xfd   : > { %1327 = vmatpush3.bf16.msra.mxu0 %v1326_v20  ;;  %v2434_v52 = vld [vmem:[%s2341_s21 + $0x58] sm:$0xff]  ;;  %v2437_v53 = vld [vmem:[%s2341_s21 + $0x50] sm:$0xff]  ;;  %v434_v54 = vadd.f32 %v2427_v49, %v2430_v50  ;;  %v402_v55 = vld [vmem:[%s2349_s1 + $0x60] sm:$0xff]  ;;  %v1338_v58 = vpack.c.bf16 %v401_v46, %v400_v45  ;;  %v1340_v63 = vpack.c.bf16 %v419_v51, %v418_v48 }
  0xfe   : > { %1329 = vmatprep.subr.bf16.mxu0 %v1328_v21  ;;  %v403_v56 = vld [vmem:[%s2349_s1 + $0x68] sm:$0xff]  ;;  %v437_v57 = vadd.f32 %v2434_v52, %v2437_v53  ;;  %v420_v59 = vld [vmem:[%s2349_s1 + $0xf0] sm:$0xff]  ;;  %v421_v60 = vld [vmem:[%s2349_s1 + $0xf8] sm:$0xff] }
  0xff   : > { %426 = vadd.xlane.f32.xlu0 %v425_v42  ;;  %v2448_v61 = vld [vmem:[%s2341_s21 + $0x68] sm:$0xff]  ;;  %v2451_v62 = vld [vmem:[%s2341_s21 + $0x60] sm:$0xff]  ;;  %v2454_v0 = vld [vmem:[%s2341_s21 + $0x78] sm:$0xff]  ;;  %v1342_v12 = vpack.c.bf16 %v403_v56, %v402_v55  ;;  %v1344_v14 = vpack.c.bf16 %v421_v60, %v420_v59 }
 0x100   : > { %432 = vadd.xlane.f32.xlu1 %v431_v43  ;;  %v695_v1 = vld [vmem:[%s2356_s4] sm:$0xff]  ;;  %v696_v2 = vld [vmem:[%s2356_s4 + $0x8] sm:$0xff]  ;;  %v2459_v3 = vld [vmem:[%s2341_s21 + $0x70] sm:$0xff]  ;;  %v440_v4 = vadd.f32 %v2448_v61, %v2451_v62 }
 0x101   : > { %1331 = vmatpush3.bf16.msra.mxu0 %v1330_v29  ;;  %v1348_v5 = vpack.c.bf16 %v696_v2, %v695_v1  ;;  %v697_v6 = vld [vmem:[%s2356_s4 + $0x10] sm:$0xff]  ;;  %v698_v7 = vld [vmem:[%s2356_s4 + $0x18] sm:$0xff]  ;;  %v443_v8 = vadd.f32 %v2454_v0, %v2459_v3  ;;  %v699_v10 = vld [vmem:[%s2356_s4 + $0x20] sm:$0xff] }
 0x102   : > { %1333 = vmatprep.subr.bf16.mxu0 %v1332_v34  ;;  %v1352_v9 = vpack.c.bf16 %v698_v7, %v697_v6  ;;  %v700_v11 = vld [vmem:[%s2356_s4 + $0x28] sm:$0xff]  ;;  %v404_v13 = vld [vmem:[%s2349_s1 + $0x70] sm:$0xff]  ;;  %v405_v15 = vld [vmem:[%s2349_s1 + $0x78] sm:$0xff] }
 0x103   : > { %435 = vadd.xlane.f32.xlu0 %v434_v54  ;;  %1349 = vmatprep.subr.bf16.mxu1 %v1348_v5  ;;  %v2472_v16 = vld [vmem:[%s2341_s21 + $0x88] sm:$0xff]  ;;  %v2475_v17 = vld [vmem:[%s2341_s21 + $0x80] sm:$0xff]  ;;  %v2478_v18 = vld [vmem:[%s2341_s21 + $0x98] sm:$0xff]  ;;  %v1356_v21 = vpack.c.bf16 %v700_v11, %v699_v10  ;;  %v1346_v25 = vpack.c.bf16 %v405_v15, %v404_v13 }
 0x104   : > { %438 = vadd.xlane.f32.xlu1 %v437_v57  ;;  %1351 = vmatpush3.bf16.msra.mxu1 %v1348_v5  ;;  %v2481_v19 = vld [vmem:[%s2341_s21 + $0x90] sm:$0xff]  ;;  %v446_v20 = vadd.f32 %v2472_v16, %v2475_v17  ;;  %v702_v24 = vld [vmem:[%s2356_s4 + $0x38] sm:$0xff]  ;;  %v379_v26 = vld [vmem:[%s2341_s21 + $0xa8] sm:$0xff] }
 0x105   : > { %1335 = vmatpush3.bf16.msra.mxu0 %v1334_v44  ;;  %1353 = vmatprep.subr.bf16.mxu1 %v1352_v9  ;;  %v449_v22 = vadd.f32 %v2478_v18, %v2481_v19  ;;  %v701_v23 = vld [vmem:[%s2356_s4 + $0x30] sm:$0xff]  ;;  %v378_v27 = vld [vmem:[%s2341_s21 + $0xa0] sm:$0xff]  ;;  %v381_v29 = vld [vmem:[%s2341_s21 + $0xb8] sm:$0xff] }
 0x106   : > { %1337 = vmatprep.subr.bf16.mxu0 %v1336_v47  ;;  %v380_v30 = vld [vmem:[%s2341_s21 + $0xb0] sm:$0xff]  ;;  %v452_v33 = vadd.f32 %v379_v26, %v378_v27  ;;  %v1360_v34 = vpack.c.bf16 %v702_v24, %v701_v23  ;;  %v703_v38 = vld [vmem:[%s2356_s4 + $0x40] sm:$0xff]  ;;  %v704_v39 = vld [vmem:[%s2356_s4 + $0x48] sm:$0xff] }
 0x107   : > { %441 = vadd.xlane.f32.xlu0 %v440_v4  ;;  %v455_v35 = vadd.f32 %v381_v29, %v380_v30  ;;  %v383_v42 = vld [vmem:[%s2341_s21 + $0xc8] sm:$0xff]  ;;  %v382_v43 = vld [vmem:[%s2341_s21 + $0xc0] sm:$0xff]  ;;  %v385_v44 = vld [vmem:[%s2341_s21 + $0xd8] sm:$0xff]  ;;  %v1364_v47 = vpack.c.bf16 %v704_v39, %v703_v38 }
 0x108   : > { %444 = vadd.xlane.f32.xlu1 %v443_v8  ;;  %1355 = vmatpush3.bf16.msra.mxu1 %v1352_v9  ;;  %v384_v45 = vld [vmem:[%s2341_s21 + $0xd0] sm:$0xff]  ;;  %v458_v46 = vadd.f32 %v383_v42, %v382_v43  ;;  %v387_v51 = vld [vmem:[%s2341_s21 + $0xe8] sm:$0xff]  ;;  %v386_v54 = vld [vmem:[%s2341_s21 + $0xe0] sm:$0xff] }
 0x109   : > { %1339 = vmatpush3.bf16.msra.mxu0 %v1338_v58  ;;  %1357 = vmatprep.subr.bf16.mxu1 %v1356_v21  ;;  %v461_v48 = vadd.f32 %v385_v44, %v384_v45  ;;  %v389_v55 = vld [vmem:[%s2341_s21 + $0xf8] sm:$0xff]  ;;  %v388_v56 = vld [vmem:[%s2341_s21 + $0xf0] sm:$0xff]  ;;  %v464_v57 = vadd.f32 %v387_v51, %v386_v54  ;;  %s2754_s21 = sld [smem:[#allocation21_spill]] }
 0x10a   : > { %1341 = vmatprep.subr.bf16.mxu0 %v1340_v63  ;;  %v467_v58 = vadd.f32 %v389_v55, %v388_v56 }
 0x10b   : > { %447 = vadd.xlane.f32.xlu0 %v446_v20 }
 0x10c   : > { %450 = vadd.xlane.f32.xlu1 %v449_v22  ;;  %1359 = vmatpush3.bf16.msra.mxu1 %v1356_v21 }
 0x10d   : > { %1343 = vmatpush3.bf16.msra.mxu0 %v1342_v12  ;;  %1361 = vmatprep.subr.bf16.mxu1 %v1360_v34 }
 0x10e   : > { %1345 = vmatprep.subr.bf16.mxu0 %v1344_v14 }
 0x10f   : > { %453 = vadd.xlane.f32.xlu0 %v452_v33  ;;  %p1137_p6 = scmp.ne.s32.totalorder %s2754_s21, 2 }
 0x110   : > { %456 = vadd.xlane.f32.xlu1 %v455_v35  ;;  %1363 = vmatpush3.bf16.msra.mxu1 %v1360_v34 }
 0x111   : > { %1347 = vmatpush3.bf16.msra.mxu0 %v1346_v25  ;;  %1365 = vmatprep.subr.bf16.mxu1 %v1364_v47 }
 0x113   : > { %459 = vadd.xlane.f32.xlu0 %v458_v46 }
 0x114   : > { %583 = vmatmul.mubr.f32.vlgmr.msra.gmra.mrb[0].mxu0 %v2393_v28  ;;  %462 = vadd.xlane.f32.xlu1 %v461_v48  ;;  %v705_v28 = vld [vmem:[%s2356_s4 + $0x50] sm:$0xff] }
 0x115   : > { %587 = vmatprep.mubr.f32.mxu0 %v2405_v36  ;;  %1367 = vmatpush3.bf16.msra.mxu1 %v1364_v47  ;;  %v706_v36 = vld [vmem:[%s2356_s4 + $0x58] sm:$0xff] }
 0x116   : > { %v1368_v59 = vpack.c.bf16 %v706_v36, %v705_v28 }
 0x117   : > { %465 = vadd.xlane.f32.xlu0 %v464_v57 }
 0x118   : > { %588 = vmatmul.mubr.f32.gmra.mrb[2].mxu0 %v2408_v37  ;;  %468 = vadd.xlane.f32.xlu1 %v467_v58 }
 0x119   : > { %592 = vmatprep.mubr.f32.mxu0 %v2397_v31  ;;  %1369 = vmatprep.subr.bf16.mxu1 %v1368_v59  ;;  %v707_v31 = vld [vmem:[%s2356_s4 + $0x60] sm:$0xff] }
 0x11a   : > { %1371 = vmatpush3.bf16.msra.mxu1 %v1368_v59 }
 0x11c   : > { %593 = vmatmul.mubr.f32.gmra.mrb[4].mxu0 %v2400_v32  ;;  %v708_v32 = vld [vmem:[%s2356_s4 + $0x68] sm:$0xff] }
 0x11d   : > { %597 = vmatprep.mubr.f32.mxu0 %v2414_v40  ;;  %v1372_v37 = vpack.c.bf16 %v708_v32, %v707_v31  ;;  %v709_v40 = vld [vmem:[%s2356_s4 + $0x70] sm:$0xff] }
 0x11f   : > { %1373 = vmatprep.subr.bf16.mxu1 %v1372_v37 }
 0x120   : > { %598 = vmatmul.mubr.f32.gmra.mrb[6].mxu0 %v2417_v41  ;;  %1375 = vmatpush3.bf16.msra.mxu1 %v1372_v37  ;;  %v710_v41 = vld [vmem:[%s2356_s4 + $0x78] sm:$0xff] }
 0x121   : > { %602 = vmatprep.mubr.f32.mxu0 %v2427_v49  ;;  %v1376_v49 = vpack.c.bf16 %v710_v41, %v709_v40 }
 0x123   : > { %1377 = vmatprep.subr.bf16.mxu1 %v1376_v49 }
 0x124   : > { %603 = vmatmul.mubr.f32.gmra.mrb[8].mxu0 %v2430_v50  ;;  %1379 = vmatpush3.bf16.msra.mxu1 %v1376_v49 }
 0x125   : > { %607 = vmatprep.mubr.f32.mxu0 %v2434_v52 }
 0x128   : > { %608 = vmatmul.mubr.f32.gmra.mrb[10].mxu0 %v2437_v53 }
 0x129   : > { %612 = vmatprep.mubr.f32.mxu0 %v2448_v61 }
 0x12c   : > { %613 = vmatmul.mubr.f32.gmra.mrb[12].mxu0 %v2451_v62 }
 0x12d   : > { %617 = vmatprep.mubr.f32.mxu0 %v2454_v0 }
 0x130   : > { %618 = vmatmul.mubr.f32.gmra.mrb[14].mxu0 %v2459_v3 }
 0x131   : > { %622 = vmatprep.mubr.f32.mxu0 %v2472_v16 }
 0x134   : > { %623 = vmatmul.mubr.f32.gmra.mrb[16].mxu0 %v2475_v17 }
 0x135   : > { %627 = vmatprep.mubr.f32.mxu0 %v2478_v18 }
 0x138   : > { %628 = vmatmul.mubr.f32.gmra.mrb[18].mxu0 %v2481_v19 }
 0x139   : > { %632 = vmatprep.mubr.f32.mxu0 %v379_v26 }
 0x13c   : > { %633 = vmatmul.mubr.f32.gmra.mrb[20].mxu0 %v378_v27 }
 0x13d   : > { %637 = vmatprep.mubr.f32.mxu0 %v381_v29 }
 0x140   : > { %638 = vmatmul.mubr.f32.gmra.mrb[22].mxu0 %v380_v30 }
 0x141   : > { %642 = vmatprep.mubr.f32.mxu0 %v383_v42 }
 0x144   : > { %643 = vmatmul.mubr.f32.gmra.mrb[24].mxu0 %v382_v43 }
 0x145   : > { %647 = vmatprep.mubr.f32.mxu0 %v385_v44 }
 0x148   : > { %648 = vmatmul.mubr.f32.gmra.mrb[26].mxu0 %v384_v45 }
 0x149   : > { %652 = vmatprep.mubr.f32.mxu0 %v387_v51 }
 0x14c   : > { %653 = vmatmul.mubr.f32.gmra.mrb[28].mxu0 %v386_v54 }
 0x14d   : > { %657 = vmatprep.mubr.f32.mxu0 %v389_v55 }
 0x150   : > { %658 = vmatmul.mubr.f32.gmra.mrb[30].mxu0 %v388_v56 }
 0x188   : > { %v424_v50 = vpop.xlane.xlu0 %423 }
 0x189   : > { %1575 = vrcp.f32 %v424_v50  ;;  %v430_v53 = vpop.xlane.xlu1 %429  ;;  %vm470_vm0 = vcmp.gt.f32.partialorder %v424_v50, 0.0 }
 0x18a   : > { %vm472_vm2 = vcmp.gt.f32.partialorder %v430_v53, 0.0 }
 0x18c   : > { %v427_v52 = vpop.xlane.xlu0 %426 }
 0x18d   : > { %1577 = vrcp.f32 %v427_v52  ;;  %v433_v60 = vpop.xlane.xlu1 %432  ;;  %vm471_vm1 = vcmp.gt.f32.partialorder %v427_v52, 0.0 }
 0x18e   : > { %1579 = vrcp.f32 %v430_v53  ;;  %vm473_vm3 = vcmp.gt.f32.partialorder %v433_v60, 0.0 }
 0x18f   : > { %1581 = vrcp.f32 %v433_v60 }
 0x190   : > { %v436_v1 = vpop.xlane.xlu0 %435 }
 0x191   : > { %1583 = vrcp.f32 %v436_v1  ;;  %v439_v8 = vpop.xlane.xlu1 %438  ;;  %vm474_vm4 = vcmp.gt.f32.partialorder %v436_v1, 0.0 }
 0x192   : > { %1585 = vrcp.f32 %v439_v8  ;;  %vm475_vm5 = vcmp.gt.f32.partialorder %v439_v8, 0.0 }
 0x193   : > { %v1576_v61 = vpop.eup %1575 }
 0x194   : > { %v502_v0 = vsel %vm470_vm0, %v1576_v61, 0.0  ;;  %v442_v15 = vpop.xlane.xlu0 %441 }
 0x195   : > { %1587 = vrcp.f32 %v442_v15  ;;  %v445_v22 = vpop.xlane.xlu1 %444  ;;  %vm476_vm6 = vcmp.gt.f32.partialorder %v442_v15, 0.0 }
 0x196   : > { %1589 = vrcp.f32 %v445_v22  ;;  %vm477_vm7 = vcmp.gt.f32.partialorder %v445_v22, 0.0 }
 0x197   : > { %v1578_v2 = vpop.eup %1577 }
 0x198   : > { %v503_v6 = vsel %vm471_vm1, %v1578_v2, 0.0  ;;  %v1580_v9 = vpop.eup %1579  ;;  %v448_v30 = vpop.xlane.xlu0 %447 }
 0x199   : > { %v504_v13 = vsel %vm472_vm2, %v1580_v9, 0.0  ;;  %v1582_v16 = vpop.eup %1581  ;;  %1591 = vrcp.f32 %v448_v30  ;;  %v451_v43 = vpop.xlane.xlu1 %450  ;;  %vm478_vm8 = vcmp.gt.f32.partialorder %v448_v30, 0.0 }
 0x19a   : > { %v505_v20 = vsel %vm473_vm3, %v1582_v16, 0.0  ;;  %1593 = vrcp.f32 %v451_v43  ;;  %vm479_vm9 = vcmp.gt.f32.partialorder %v451_v43, 0.0 }
 0x19b   : > { %v1584_v23 = vpop.eup %1583 }
 0x19c   : > { %v506_v27 = vsel %vm474_vm4, %v1584_v23, 0.0  ;;  %v1586_v33 = vpop.eup %1585  ;;  %v454_v54 = vpop.xlane.xlu0 %453 }
 0x19d   : > { %v507_v39 = vsel %vm475_vm5, %v1586_v33, 0.0  ;;  %1595 = vrcp.f32 %v454_v54  ;;  %v457_v32 = vpop.xlane.xlu1 %456  ;;  %vm480_vm10 = vcmp.gt.f32.partialorder %v454_v54, 0.0 }
 0x19e   : > { %1597 = vrcp.f32 %v457_v32  ;;  %vm481_vm11 = vcmp.gt.f32.partialorder %v457_v32, 0.0 }
 0x19f   : > { %v1588_v44 = vpop.eup %1587 }
 0x1a0   : > { %v508_v48 = vsel %vm476_vm6, %v1588_v44, 0.0  ;;  %v1590_v55 = vpop.eup %1589  ;;  %v460_v53 = vpop.xlane.xlu0 %459 }
 0x1a1   : > { %v509_v28 = vsel %vm477_vm7, %v1590_v55, 0.0  ;;  %1599 = vrcp.f32 %v460_v53  ;;  %v463_v2 = vpop.xlane.xlu1 %462  ;;  %vm482_vm12 = vcmp.gt.f32.partialorder %v460_v53, 0.0  ;;  %v686_v53 = vld [vmem:[#allocation2 + $0x38] sm:$0xff] }
 0x1a2   : > { %1601 = vrcp.f32 %v463_v2  ;;  %vm483_vm13 = vcmp.gt.f32.partialorder %v463_v2, 0.0  ;;  %v687_v2 = vld [vmem:[#allocation2 + $0x40] sm:$0xff] }
 0x1a3   : > { %v1592_v59 = vpop.eup %1591 }
 0x1a4   : > { %v510_v41 = vsel %vm478_vm8, %v1592_v59, 0.0  ;;  %v1594_v50 = vpop.eup %1593  ;;  %v466_v8 = vpop.xlane.xlu0 %465 }
 0x1a5   : > { %1603 = vrcp.f32 %v466_v8  ;;  %v469_v15 = vpop.xlane.xlu1 %468  ;;  %vm484_vm14 = vcmp.gt.f32.partialorder %v466_v8, 0.0  ;;  %v689_v8 = vld [vmem:[#allocation2 + $0x50] sm:$0xff] }
 0x1a6   : > { %1605 = vrcp.f32 %v469_v15  ;;  %vm485_vm15 = vcmp.gt.f32.partialorder %v469_v15, 0.0 }
 0x1e7   : > { %v1180_v62 = vpop.f32.mrb[0].mxu0 }
 0x1e8   : > { %v1181_v63 = vpop.f32.mrb[1].mxu0 }
 0x1e9   : > { %v1182_v3 = vadd.f32 %v1181_v63, %v1180_v62  ;;  %v511_v62 = vsel %vm479_vm9, %v1594_v50, 0.0 }
 0x1eb   : > { %v1183_v4 = vpop.f32.mrb[2].mxu0  ;;  %v663_v5 = vmul.f32 %v1182_v3, %v502_v0  ;;  %v1596_v0 = vpop.eup %1595 }
 0x1ec   : > { %v1184_v7 = vpop.f32.mrb[3].mxu0  ;;  %v1598_v9 = vpop.eup %1597 }
 0x1ed   : > { %v1185_v10 = vadd.f32 %v1184_v7, %v1183_v4  ;;  %1292 = vmatprep.mubr.f32.mxu1 %v663_v5  ;;  %v512_v5 = vsel %vm480_vm10, %v1596_v0, 0.0  ;;  %v1600_v16 = vpop.eup %1599 }
 0x1ee   : > { %v1602_v22 = vpop.eup %1601 }
 0x1ef   : > { %v664_v11 = vmul.f32 %v1185_v10, %v503_v6  ;;  %v1186_v12 = vpop.f32.mrb[4].mxu0 }
 0x1f0   : > { %v1187_v14 = vpop.f32.mrb[5].mxu0 }
 0x1f1   : > { %v1188_v17 = vadd.f32 %v1187_v14, %v1186_v12  ;;  %1293 = vmatmul.mubr.f32.vlgmr.msra.gmra.mrb[0].mxu1 %v664_v11  ;;  %v513_v14 = vsel %vm481_vm11, %v1598_v9, 0.0 }
 0x1f3   : > { %v665_v18 = vmul.f32 %v1188_v17, %v504_v13  ;;  %v1189_v19 = vpop.f32.mrb[6].mxu0 }
 0x1f4   : > { %v1190_v21 = vpop.f32.mrb[7].mxu0 }
 0x1f5   : > { %v1191_v24 = vadd.f32 %v1190_v21, %v1189_v19  ;;  %1295 = vmatprep.mubr.f32.mxu1 %v665_v18  ;;  %v514_v21 = vsel %vm482_vm12, %v1600_v16, 0.0 }
 0x1f7   : > { %v666_v25 = vmul.f32 %v1191_v24, %v505_v20  ;;  %v1192_v26 = vpop.f32.mrb[8].mxu0 }
 0x1f8   : > { %v1193_v29 = vpop.f32.mrb[9].mxu0 }
 0x1f9   : > { %v1194_v34 = vadd.f32 %v1193_v29, %v1192_v26  ;;  %1296 = vmatmul.mubr.f32.gmra.mrb[2].mxu1 %v666_v25  ;;  %v1604_v29 = vpop.eup %1603 }
 0x1fb   : > { %v667_v35 = vmul.f32 %v1194_v34, %v506_v27  ;;  %v1195_v38 = vpop.f32.mrb[10].mxu0  ;;  %v515_v27 = vsel %vm483_vm13, %v1602_v22, 0.0 }
 0x1fc   : > { %v1196_v42 = vpop.f32.mrb[11].mxu0 }
 0x1fd   : > { %v1197_v45 = vadd.f32 %v1196_v42, %v1195_v38  ;;  %1298 = vmatprep.mubr.f32.mxu1 %v667_v35  ;;  %v516_v38 = vsel %vm484_vm14, %v1604_v29, 0.0 }
 0x1ff   : > { %v668_v46 = vmul.f32 %v1197_v45, %v507_v39  ;;  %v1198_v47 = vpop.f32.mrb[12].mxu0  ;;  %v1606_v39 = vpop.eup %1605 }
 0x200   : > { %v1199_v51 = vpop.f32.mrb[13].mxu0 }
 0x201   : > { %v1200_v56 = vadd.f32 %v1199_v51, %v1198_v47  ;;  %1299 = vmatmul.mubr.f32.gmra.mrb[4].mxu1 %v668_v46  ;;  %v517_v46 = vsel %vm485_vm15, %v1606_v39, 0.0  ;;  %v679_v51 = vld [vmem:[#allocation2] sm:$0xff] }
 0x203   : > { %v669_v57 = vmul.f32 %v1200_v56, %v508_v48  ;;  %v1201_v58 = vpop.f32.mrb[14].mxu0  ;;  %v680_v48 = vld [vmem:[#allocation2 + $0x8] sm:$0xff] }
 0x204   : > { %v1202_v36 = vpop.f32.mrb[15].mxu0 }
 0x205   : > { %v1203_v31 = vadd.f32 %v1202_v36, %v1201_v58  ;;  %1301 = vmatprep.mubr.f32.mxu1 %v669_v57  ;;  %v682_v58 = vld [vmem:[#allocation2 + $0x18] sm:$0xff] }
 0x207   : > { %v670_v37 = vmul.f32 %v1203_v31, %v509_v28  ;;  %v1204_v40 = vpop.f32.mrb[16].mxu0  ;;  %v681_v28 = vld [vmem:[#allocation2 + $0x10] sm:$0xff] }
 0x208   : > { %v1205_v49 = vpop.f32.mrb[17].mxu0 }
 0x209   : > { %v1206_v52 = vadd.f32 %v1205_v49, %v1204_v40  ;;  %1302 = vmatmul.mubr.f32.gmra.mrb[6].mxu1 %v670_v37  ;;  %v684_v37 = vld [vmem:[#allocation2 + $0x28] sm:$0xff]  ;;  %v683_v40 = vld [vmem:[#allocation2 + $0x20] sm:$0xff] }
 0x20b   : > { %v671_v60 = vmul.f32 %v1206_v52, %v510_v41  ;;  %v1207_v61 = vpop.f32.mrb[18].mxu0 }
 0x20c   : > { %v1208_v63 = vpop.f32.mrb[19].mxu0 }
 0x20d   : > { %v1209_v1 = vadd.f32 %v1208_v63, %v1207_v61  ;;  %1304 = vmatprep.mubr.f32.mxu1 %v671_v60  ;;  %v685_v60 = vld [vmem:[#allocation2 + $0x30] sm:$0xff] }
 0x20f   : > { %v672_v3 = vmul.f32 %v1209_v1, %v511_v62  ;;  %v1210_v4 = vpop.f32.mrb[20].mxu0  ;;  %v688_v1 = vld [vmem:[#allocation2 + $0x48] sm:$0xff] }
 0x210   : > { %v1211_v6 = vpop.f32.mrb[21].mxu0 }
 0x211   : > { %v1212_v7 = vadd.f32 %v1211_v6, %v1210_v4  ;;  %1305 = vmatmul.mubr.f32.gmra.mrb[8].mxu1 %v672_v3 }
 0x213   : > { %v673_v10 = vmul.f32 %v1212_v7, %v512_v5  ;;  %v1213_v11 = vpop.f32.mrb[22].mxu0  ;;  %v690_v7 = vld [vmem:[#allocation2 + $0x58] sm:$0xff] }
 0x214   : > { %v1214_v12 = vpop.f32.mrb[23].mxu0 }
 0x215   : > { %v1215_v13 = vadd.f32 %v1214_v12, %v1213_v11  ;;  %1307 = vmatprep.mubr.f32.mxu1 %v673_v10 }
 0x217   : > { %v674_v17 = vmul.f32 %v1215_v13, %v513_v14  ;;  %v1216_v18 = vpop.f32.mrb[24].mxu0  ;;  %v692_v13 = vld [vmem:[#allocation2 + $0x68] sm:$0xff]  ;;  %v691_v14 = vld [vmem:[#allocation2 + $0x60] sm:$0xff] }
 0x218   : > { %v1217_v19 = vpop.f32.mrb[25].mxu0 }
 0x219   : > { %v1218_v20 = vadd.f32 %v1217_v19, %v1216_v18  ;;  %1308 = vmatmul.mubr.f32.gmra.mrb[10].mxu1 %v674_v17  ;;  %v694_v19 = vld [vmem:[#allocation2 + $0x78] sm:$0xff] }
 0x21b   : > { %v675_v23 = vmul.f32 %v1218_v20, %v514_v21  ;;  %v1219_v24 = vpop.f32.mrb[26].mxu0  ;;  %v693_v20 = vld [vmem:[#allocation2 + $0x70] sm:$0xff] }
 0x21c   : > { %v1220_v25 = vpop.f32.mrb[27].mxu0 }
 0x21d   : > { %v1221_v26 = vadd.f32 %v1220_v25, %v1219_v24  ;;  %1310 = vmatprep.mubr.f32.mxu1 %v675_v23 }
 0x21f   : > { %v676_v30 = vmul.f32 %v1221_v26, %v515_v27  ;;  %v1222_v33 = vpop.f32.mrb[28].mxu0  ;;  %v1138_v26 = vld [vmem:[#allocation9] ss:$0 sm:$0xff] (!%p1137_p6) }
 0x220   : > { %v1223_v34 = vpop.f32.mrb[29].mxu0 }
 0x221   : > { %v1224_v35 = vadd.f32 %v1223_v34, %v1222_v33  ;;  %1311 = vmatmul.mubr.f32.gmra.mrb[12].mxu1 %v676_v30 }
 0x223   : > { %v677_v42 = vmul.f32 %v1224_v35, %v516_v38  ;;  %v1225_v43 = vpop.f32.mrb[30].mxu0 }
 0x224   : > { %v1226_v44 = vpop.f32.mrb[31].mxu0 }
 0x225   : > { %v1227_v45 = vadd.f32 %v1226_v44, %v1225_v43  ;;  %1313 = vmatprep.mubr.f32.mxu1 %v677_v42 }
 0x227   : > { %v678_v47 = vmul.f32 %v1227_v45, %v517_v46 }
 0x229   : > { %1314 = vmatmul.mubr.f32.gmra.mrb[14].mxu1 %v678_v47 }
 0x2c4   : > { %v1294_v54 = vpop.f32.mrb[0].mxu1 }
 0x2c5   : > { %v857_v55 = vadd.f32 %v1294_v54, %v680_v48  ;;  %v777_v56 = vpop.f32.mrb[1].mxu1 }
 0x2c6   : > { %v856_v57 = vadd.f32 %v777_v56, %v679_v51 }
 0x2c7   : > { %873 = vst [vmem:[#allocation2 + $0x8] sm:$0xff] %v857_v55 }
 0x2c8   : > { %872 = vst [vmem:[#allocation2] sm:$0xff] %v856_v57 }
 0x2cc   : > { %v1297_v36 = vpop.f32.mrb[2].mxu1 }
 0x2cd   : > { %v859_v59 = vadd.f32 %v1297_v36, %v682_v58  ;;  %v787_v31 = vpop.f32.mrb[3].mxu1 }
 0x2ce   : > { %v858_v32 = vadd.f32 %v787_v31, %v681_v28  ;;  %v893_v27 = vld [vmem:[#allocation2 + $0x8] sm:$0xff] (!%p1137_p6) }
 0x2cf   : > { %875 = vst [vmem:[#allocation2 + $0x18] sm:$0xff] %v859_v59  ;;  %v892_v25 = vld [vmem:[#allocation2] sm:$0xff] (!%p1137_p6)  ;;  %v916_v30 = vadd.f32 (!%p1137_p6), %v1138_v26, %v893_v27 }
 0x2d0   : > { %874 = vst [vmem:[#allocation2 + $0x10] sm:$0xff] %v858_v32  ;;  %v915_v29 = vadd.f32 (!%p1137_p6), %v1138_v26, %v892_v25 }
 0x2d1   : > { %932 = vst [vmem:[%s2369_s16 + $0x8] sm:$0xff] (!%p1137_p6), %v916_v30 }
 0x2d2   : > { %931 = vst [vmem:[%s2369_s16] sm:$0xff] (!%p1137_p6), %v915_v29 }
 0x2d4   : > { %v1300_v41 = vpop.f32.mrb[4].mxu1 }
 0x2d5   : > { %v861_v49 = vadd.f32 %v1300_v41, %v684_v37  ;;  %v797_v50 = vpop.f32.mrb[5].mxu1 }
 0x2d6   : > { %v860_v52 = vadd.f32 %v797_v50, %v683_v40  ;;  %v895_v34 = vld [vmem:[#allocation2 + $0x18] sm:$0xff] (!%p1137_p6) }
 0x2d7   : > { %877 = vst [vmem:[#allocation2 + $0x28] sm:$0xff] %v861_v49  ;;  %v894_v33 = vld [vmem:[#allocation2 + $0x10] sm:$0xff] (!%p1137_p6)  ;;  %v918_v39 = vadd.f32 (!%p1137_p6), %v1138_v26, %v895_v34 }
 0x2d8   : > { %876 = vst [vmem:[#allocation2 + $0x20] sm:$0xff] %v860_v52  ;;  %v917_v38 = vadd.f32 (!%p1137_p6), %v1138_v26, %v894_v33 }
 0x2d9   : > { %934 = vst [vmem:[%s2369_s16 + $0x18] sm:$0xff] (!%p1137_p6), %v918_v39 }
 0x2da   : > { %933 = vst [vmem:[%s2369_s16 + $0x10] sm:$0xff] (!%p1137_p6), %v917_v38 }
 0x2dc   : > { %v1303_v61 = vpop.f32.mrb[6].mxu1 }
 0x2dd   : > { %v863_v62 = vadd.f32 %v1303_v61, %v686_v53  ;;  %v807_v63 = vpop.f32.mrb[7].mxu1 }
 0x2de   : > { %v862_v0 = vadd.f32 %v807_v63, %v685_v60  ;;  %v897_v43 = vld [vmem:[#allocation2 + $0x28] sm:$0xff] (!%p1137_p6) }
 0x2df   : > { %879 = vst [vmem:[#allocation2 + $0x38] sm:$0xff] %v863_v62  ;;  %v896_v35 = vld [vmem:[#allocation2 + $0x20] sm:$0xff] (!%p1137_p6)  ;;  %v920_v46 = vadd.f32 (!%p1137_p6), %v1138_v26, %v897_v43 }
 0x2e0   : > { %878 = vst [vmem:[#allocation2 + $0x30] sm:$0xff] %v862_v0  ;;  %v919_v42 = vadd.f32 (!%p1137_p6), %v1138_v26, %v896_v35 }
 0x2e1   : > { %936 = vst [vmem:[%s2369_s16 + $0x28] sm:$0xff] (!%p1137_p6), %v920_v46 }
 0x2e2   : > { %935 = vst [vmem:[%s2369_s16 + $0x20] sm:$0xff] (!%p1137_p6), %v919_v42 }
 0x2e4   : > { %v1306_v3 = vpop.f32.mrb[8].mxu1 }
 0x2e5   : > { %v865_v4 = vadd.f32 %v1306_v3, %v688_v1  ;;  %v817_v5 = vpop.f32.mrb[9].mxu1 }
 0x2e6   : > { %v864_v6 = vadd.f32 %v817_v5, %v687_v2  ;;  %v899_v45 = vld [vmem:[#allocation2 + $0x38] sm:$0xff] (!%p1137_p6) }
 0x2e7   : > { %881 = vst [vmem:[#allocation2 + $0x48] sm:$0xff] %v865_v4  ;;  %v898_v44 = vld [vmem:[#allocation2 + $0x30] sm:$0xff] (!%p1137_p6)  ;;  %v922_v48 = vadd.f32 (!%p1137_p6), %v1138_v26, %v899_v45 }
 0x2e8   : > { %880 = vst [vmem:[#allocation2 + $0x40] sm:$0xff] %v864_v6  ;;  %v921_v47 = vadd.f32 (!%p1137_p6), %v1138_v26, %v898_v44 }
 0x2e9   : > { %938 = vst [vmem:[%s2369_s16 + $0x38] sm:$0xff] (!%p1137_p6), %v922_v48 }
 0x2ea   : > { %937 = vst [vmem:[%s2369_s16 + $0x30] sm:$0xff] (!%p1137_p6), %v921_v47 }
 0x2ec   : > { %v1309_v9 = vpop.f32.mrb[10].mxu1 }
 0x2ed   : > { %v867_v10 = vadd.f32 %v1309_v9, %v690_v7  ;;  %v827_v11 = vpop.f32.mrb[11].mxu1 }
 0x2ee   : > { %v866_v12 = vadd.f32 %v827_v11, %v689_v8  ;;  %v901_v54 = vld [vmem:[#allocation2 + $0x48] sm:$0xff] (!%p1137_p6) }
 0x2ef   : > { %883 = vst [vmem:[#allocation2 + $0x58] sm:$0xff] %v867_v10  ;;  %v900_v51 = vld [vmem:[#allocation2 + $0x40] sm:$0xff] (!%p1137_p6)  ;;  %v924_v57 = vadd.f32 (!%p1137_p6), %v1138_v26, %v901_v54 }
 0x2f0   : > { %882 = vst [vmem:[#allocation2 + $0x50] sm:$0xff] %v866_v12  ;;  %v923_v56 = vadd.f32 (!%p1137_p6), %v1138_v26, %v900_v51 }
 0x2f1   : > { %940 = vst [vmem:[%s2369_s16 + $0x48] sm:$0xff] (!%p1137_p6), %v924_v57 }
 0x2f2   : > { %939 = vst [vmem:[%s2369_s16 + $0x40] sm:$0xff] (!%p1137_p6), %v923_v56 }
 0x2f4   : > { %v1312_v15 = vpop.f32.mrb[12].mxu1 }
 0x2f5   : > { %v869_v16 = vadd.f32 %v1312_v15, %v692_v13  ;;  %v837_v17 = vpop.f32.mrb[13].mxu1 }
 0x2f6   : > { %v868_v18 = vadd.f32 %v837_v17, %v691_v14  ;;  %v903_v28 = vld [vmem:[#allocation2 + $0x58] sm:$0xff] (!%p1137_p6) }
 0x2f7   : > { %885 = vst [vmem:[#allocation2 + $0x68] sm:$0xff] %v869_v16  ;;  %v902_v55 = vld [vmem:[#allocation2 + $0x50] sm:$0xff] (!%p1137_p6)  ;;  %v926_v31 = vadd.f32 (!%p1137_p6), %v1138_v26, %v903_v28 }
 0x2f8   : > { %884 = vst [vmem:[#allocation2 + $0x60] sm:$0xff] %v868_v18  ;;  %v925_v58 = vadd.f32 (!%p1137_p6), %v1138_v26, %v902_v55 }
 0x2f9   : > { %942 = vst [vmem:[%s2369_s16 + $0x58] sm:$0xff] (!%p1137_p6), %v926_v31 }
 0x2fa   : > { %891 = sbr.rel (%p1137_p6) target bundleno = 779 (0x30b), region = 60  ;;  %941 = vst [vmem:[%s2369_s16 + $0x50] sm:$0xff] (!%p1137_p6), %v925_v58 }
 0x2fc   : > { %v1315_v21 = vpop.f32.mrb[14].mxu1 }
 0x2fd   : > { %v871_v22 = vadd.f32 %v1315_v21, %v694_v19  ;;  %v847_v23 = vpop.f32.mrb[15].mxu1 }
 0x2fe   : > { %v870_v24 = vadd.f32 %v847_v23, %v693_v20  ;;  %v905_v59 = vld [vmem:[#allocation2 + $0x68] sm:$0xff] (!%p1137_p6) }
 0x2ff   : > { %887 = vst [vmem:[#allocation2 + $0x78] sm:$0xff] %v871_v22  ;;  %v904_v36 = vld [vmem:[#allocation2 + $0x60] sm:$0xff] (!%p1137_p6)  ;;  %v928_v37 = vadd.f32 (!%p1137_p6), %v1138_v26, %v905_v59 }
 0x300   : > { %886 = vst [vmem:[#allocation2 + $0x70] sm:$0xff] %v870_v24  ;;  %v927_v32 = vadd.f32 (!%p1137_p6), %v1138_v26, %v904_v36 }
 0x301   : > { %944 = vst [vmem:[%s2369_s16 + $0x68] sm:$0xff] %v928_v37 }
 0x302   : > { %943 = vst [vmem:[%s2369_s16 + $0x60] sm:$0xff] %v927_v32 }
 0x306   : > { %v907_v41 = vld [vmem:[#allocation2 + $0x78] sm:$0xff] }
 0x307   : > { %v906_v40 = vld [vmem:[#allocation2 + $0x70] sm:$0xff]  ;;  %v930_v50 = vadd.f32 %v1138_v26, %v907_v41 }
 0x308   : > { %v929_v49 = vadd.f32 %v1138_v26, %v906_v40 }
 0x309   : > { %946 = vst [vmem:[%s2369_s16 + $0x78] sm:$0xff] %v930_v50 }
 0x30a   : > { %945 = vst [vmem:[%s2369_s16 + $0x70] sm:$0xff] %v929_v49 }
 0x30b PF: > { %s2755_s10 = sld [smem:[#allocation22_spill]]  ;;  %s2756_s27 = sld [smem:[#allocation23_spill]] }
 0x30c   : > { %s2758_s12 = sld [smem:[#allocation31_spill]]  ;;  %s963_s28 = sshll.u32 %s2369_s16, 4  ;;  %s2548_s28 = int_to_ptr.vmem [resolvable:$true] %s963_s28 }
 0x30d   : > { %s2759_s4 = sld [smem:[#allocation40_spill]]  ;;  %s2557_s2 = scalar_lea.sflag [#allocation5], %s333_s22 }
 0x30e   : > { %s1725_s8 = scalar_lea.vmem %s2548_s28, 2048  ;;  %s1934_s16 = smov [#allocation11]  }
 0x30f   : > { %p1726_p2 = scmp.ne.s32.totalorder %s2548_s28, %s1725_s8  ;;  %s1729_s21 = sshll.u32 %s1934_s16, 4  ;;  %s1730_s21 = int_to_ptr.vmem [resolvable:$false] %s1729_s21 }
 0x310   : > { %p1732_p8 = scmp.lt.s32.totalorder %s2548_s28, %s1730_s21 }
 0x311   : > { %s1140_s29 = sshll.u32 %s2755_s10, 4  ;;  %s1141_s3 = sshll.u32 %s2756_s27, 5 }
 0x312   : > { %s960_s1 = sadd.s32 %s1141_s3, %s1140_s29  ;;  %p2760_p3 = scmp.ne.s32.totalorder %s2758_s12, 0 }
 0x313   : > { %s1142_s5 = sshll.u32 %s960_s1, 7  ;;  %s1731_s10 = scalar_lea.vmem %s1730_s21, 4096 }
 0x314   : > { %s2553_s18 = scalar_lea.hbm %s2759_s4, %s1142_s5  ;;  %p1727_p4 = pnand %p1726_p2, %p2760_p3 }
 0x315   : > { %p1733_p0 = scmp.lt.s32.totalorder %s1731_s10, %s1725_s8 }
 0x316   : > { %p1728_p7 = pneg %p1727_p4 }
 0x317   : > { %p1734_p5 = por %p1733_p0, %p1732_p8 }
 0x319   : > { %p1735_p9 = pnand %p1734_p5, %p1728_p7 }
 0x31b   : > { %1738 = shalt.err (!%p1735_p9)
}
 0x31c   : > { %s1739_s22 = scalar_lea.hbm %s2553_s18, 2048  ;;  %s1743_s29 = scalar_lea.hbm %s2759_s4, 8192 }
 0x31d   : > { %p1740_p11 = scmp.ne.s32.totalorder %s2553_s18, %s1739_s22  ;;  %p1744_p10 = scmp.lt.u32.totalorder %s2553_s18, %s2759_s4 }
 0x31e   : > { %p1745_p12 = scmp.lt.u32.totalorder %s1743_s29, %s1739_s22  ;;  %p1747_p2 = scmp.lt.u32.totalorder %s1739_s22, %s2553_s18 }
 0x31f   : > { %p1741_p13 = pnand %p1740_p11, %p2760_p3 }
 0x320   : > { %p1746_p6 = por %p1745_p12, %p1744_p10 }
 0x321   : > { %p1742_p1 = pneg %p1741_p13 }
 0x322   : > { %p1748_p4 = por %p1747_p2, %p1746_p6 }
 0x324   : > { %p1749_p7 = pnand %p1748_p4, %p1742_p1 }
 0x326   : > { %1752 = shalt.err (!%p1749_p7)
}
 0x327   : > { %s1935_s5 = smov 128   ;;  %s1936_s6 = smov 8  }
 0x328   : > { %1391 = dma.vmem_to_hbm [thread:$0]  (%p2760_p3), %s2548_s28, 2048, %s2553_s18, %s2557_s2, %s1935_s5, %s1935_s5, %s1936_s6  }
 0x329 PF: > { %s2761_s11 = sld [smem:[#allocation17_spill]]  ;;  %s2762_s8 = sld [smem:[#allocation32_spill]] }
 0x32a   : > { %p1414_p8 = scmp.ge.s32.totalorder %s1923_s7, 2 }
 0x32f   : > { %s978_s16 = sand.u32 1, %s2761_s11   ;;  %p2763_p0 = scmp.ne.s32.totalorder %s2762_s8, 0 }
 0x330   : > { %s979_s21 = scalar_lea.sflag [#allocation5], %s978_s16 }
 0x331   : > { %p1408_p5 = pnand %p1414_p8, %p2763_p0 }
 0x333   : > { %1846 = dma.done.wait (!%p1408_p5), %s979_s21, 2048  }
 0x334   : > { %1848 = vsyncadd (!%p1408_p5), %s979_s21, 4294965248  ;;  %s24_s7 = sadd.s32 1, %s1923_s7   ;;  %s2765_s22 = sld [smem:[#allocation18_spill]] }
 0x335   : > { %p2586_p9 = scmp.ge.s32.totalorder %s24_s7, 14   ;;  %s2766_s12 = smov %s2291_s15 }
 0x336   : > { %s2767_s21 = sld [smem:[#allocation19_spill]]  ;;  %s2768_s28 = sld [smem:[#allocation20_spill]] }
 0x337   : > { %s2769_s2 = smov %s2234_s25  ;;  %s2770_s13 = sld [smem:[#allocation24_spill]] }
 0x338   : > { %s2771_s29 = sld [smem:[#allocation25_spill]]  ;;  %s2772_s3 = sld [smem:[#allocation34_spill]] }
 0x339   : > { %s2774_s5 = sld [smem:[#allocation35_spill]]  ;;  %s2775_s16 = smov %s1859_s17 }
 0x33a   : > { %s2773_s15 = smov %s2765_s22  ;;  %s2776_s6 = sld [smem:[#allocation36_spill]] }
 0x33b   : > { %s2777_s17 = smov %s2239_s24  ;;  %s2778_s18 = smov %s1867_s19 }
 0x33c   : > { %s2779_s19 = smov %s1871_s20  ;;  %s2780_s20 = smov %s2766_s12 }
 0x33d   : > { %s2781_s22 = smov %s1883_s23  ;;  %s2782_s23 = smov %s2231_s9 }
 0x33e   : > { %s2783_s24 = smov %s2768_s28  ;;  %s2784_s25 = smov %s1895_s26 }
 0x33f   : > { %s2785_s26 = smov %s2769_s2  ;;  %s2786_s27 = smov %s1911_s30 }
 0x340   : > { %s2787_s28 = smov %s2770_s13  ;;  %s2788_s30 = smov %s2772_s3 }
 0x341   :  { %23 = sbr.rel (!%p2586_p9) target bundleno = 21 (0x15), region = 117 }
 0x348   :  { %984 = vsyncpa [#allocation4], 1 }
 0x349   :  { %986 = vsyncpa [#allocation4 + $0x1], 1 }
 0x34a   :  { %987 = vsyncpa [#allocation7], 1 }
 0x34b   :  { %989 = vsyncpa [#allocation7 + $0x1], 1 }
 0x34c   :  { %990 = vsyncpa [#allocation10], 1 }
 0x34d   :  { %991 = vsyncpa [#allocation5], 1 }
 0x34e   :  { %993 = vsyncpa [#allocation5 + $0x1], 1 }

</bundles_post_ra>
